<compile_context>
chip_gen: v5e
topology: v5e:2x2
jax: 0.10.0
libtpu: 0.0.40
codegen_flags: <defaults>
</compile_context>

<pallas_src>
import jax
import jax.numpy as jnp
from jax.experimental import pallas as pl
from jax.experimental.pallas import tpu as pltpu

IN_FEATURES = 18 * 20       # 360
K_PAD = 384                 # contraction dim padded to a multiple of 128 (in VMEM scratch)
HIDDEN = 512
OUT_FEATURES = 6
OUT_PAD = 128               # output lanes padded to a full lane width
TM_MAX = 1024               # max batch-tile rows
NEG_BIG = -1e30             # finite "minus infinity" for padded logit lanes (f32/bf16-safe)


def _round_up(n, m):
    return ((n + m - 1) // m) * m


def _choose_tiling(batch):
    """Return (b_pad, tm, n_steps) for the batch grid.

    * >= 2 grid steps whenever there is enough work, so the "parallel" batch axis
      can shard across v7x's two TensorCores (neutral on v5e/v6e).
    * More steps only when a tile would exceed TM_MAX.
    * Per-tile padding only to a multiple of 8 (bounded waste, no round_up(B, TM_MAX)).
    """
    if batch <= 8:
        n_steps = 1
    else:
        n_steps = max(2, pl.cdiv(batch, TM_MAX))
    tm = _round_up(pl.cdiv(batch, n_steps), 8)
    return n_steps * tm, tm, n_steps


def mlp_softmax_kernel(x_ref, w1_ref, b1_ref, w2_ref, b2_ref, w3_ref, b3_ref,
                       o_ref, xk_ref):
    # In-kernel bf16 cast + zero-pad of the contraction dim (360 -> 384) into VMEM
    # scratch; avoids a separate pad/cast pass over x in HBM.
    xk_ref[:, :IN_FEATURES] = x_ref[...].astype(jnp.bfloat16)
    xk_ref[:, IN_FEATURES:] = jnp.zeros(
        (xk_ref.shape[0], K_PAD - IN_FEATURES), jnp.bfloat16)

    # Linear(360->512) + ReLU   (zero pad rows of w1 / zero pad lanes of xk -> exact)
    h1 = jnp.dot(xk_ref[...], w1_ref[...],
                 preferred_element_type=jnp.float32) + b1_ref[...]
    h1 = jnp.maximum(h1, 0.0)

    # Linear(512->512) + ReLU
    h2 = jnp.dot(h1.astype(jnp.bfloat16), w2_ref[...],
                 preferred_element_type=jnp.float32) + b2_ref[...]
    h2 = jnp.maximum(h2, 0.0)

    # Linear(512->6), padded to 128 lanes (pad lanes get logit = -1e30)
    logits = jnp.dot(h2.astype(jnp.bfloat16), w3_ref[...],
                     preferred_element_type=jnp.float32) + b3_ref[...]

    # Numerically stable softmax over the 128-wide padded logits.
    m = jnp.max(logits, axis=1, keepdims=True)
    e = jnp.exp(logits - m)                       # padded lanes underflow to exactly 0
    denom = jnp.sum(e, axis=1, keepdims=True)
    inv = pl.reciprocal(denom)                    # exact: only (tm, 1) values
    o_ref[...] = (e * inv).astype(o_ref.dtype)    # bf16, lane-dense padded store


def pack_params(params_f32):
    """Convert f32 (in,out)-layout params into padded / bf16 kernel params."""
    w1, b1, w2, b2, w3, b3 = params_f32

    w1p = jnp.zeros((K_PAD, HIDDEN), jnp.float32).at[:IN_FEATURES, :].set(w1)
    w3p = jnp.zeros((HIDDEN, OUT_PAD), jnp.float32).at[:, :OUT_FEATURES].set(w3)
    b3p = jnp.full((1, OUT_PAD), NEG_BIG, jnp.float32).at[:, :OUT_FEATURES].set(b3)
    # NOTE: b3p must stay f32 (or at least bf16); narrower types would overflow the
    # -1e30 pad sentinel and break the padded-lane softmax trick.
    assert b3p.dtype == jnp.float32

    return (w1p.astype(jnp.bfloat16), b1.astype(jnp.float32),
            w2.astype(jnp.bfloat16), b2.astype(jnp.float32),
            w3p.astype(jnp.bfloat16), b3p)


def neural_network_forward(x, kernel_params):
    """x: (B, 18, 20) float32 -> (B, 6) softmax probabilities (float32)."""
    w1, b1, w2, b2, w3, b3 = kernel_params
    B = x.shape[0]

    # Same row-major flatten as nn.Flatten; no K-pad / dtype cast in the wrapper.
    x_flat = x.reshape(B, IN_FEATURES)
    b_pad, tm, n_steps = _choose_tiling(B)
    if b_pad != B:
        x_flat = jnp.pad(x_flat, ((0, b_pad - B), (0, 0)))

    # Weights/biases: constant index_map -> DMA'd once, VMEM-resident across steps.
    resident = lambda shape: pl.BlockSpec(shape, lambda i: (0, 0))

    out_pad = pl.pallas_call(
        mlp_softmax_kernel,
        out_shape=jax.ShapeDtypeStruct((b_pad, OUT_PAD), jnp.bfloat16),
        grid=(n_steps,),
        in_specs=[
            pl.BlockSpec((tm, IN_FEATURES), lambda i: (i, 0)),   # x tile, f32, unpadded
            resident((K_PAD, HIDDEN)),                           # w1 (384, 512) bf16
            resident((1, HIDDEN)),                               # b1
            resident((HIDDEN, HIDDEN)),                          # w2
            resident((1, HIDDEN)),                               # b2
            resident((HIDDEN, OUT_PAD)),                         # w3 (512, 128) bf16
            resident((1, OUT_PAD)),                              # b3 (padded with -1e30)
        ],
        out_specs=pl.BlockSpec((tm, OUT_PAD), lambda i: (i, 0)),
        scratch_shapes=[pltpu.VMEM((tm, K_PAD), jnp.bfloat16)],  # bf16 zero-padded x
        compiler_params=pltpu.CompilerParams(
            dimension_semantics=("parallel",),
            vmem_limit_bytes=32 * 1024 * 1024),
    )(x_flat, w1, b1, w2, b2, w3, b3)

    return out_pad[:B, :OUT_FEATURES].astype(jnp.float32)


def init_params(key):
    """Deterministic PyTorch-Linear-like init; weights in (in, out) layout, f32."""
    k1, k2, k3 = jax.random.split(key, 3)

    def lin(k, fan_in, fan_out):
        bound = 1.0 / jnp.sqrt(fan_in)
        ka, kb = jax.random.split(k)
        w = jax.random.uniform(ka, (fan_in, fan_out), jnp.float32, -bound, bound)
        b = jax.random.uniform(kb, (1, fan_out), jnp.float32, -bound, bound)
        return w, b

    w1, b1 = lin(k1, IN_FEATURES, HIDDEN)
    w2, b2 = lin(k2, HIDDEN, HIDDEN)
    w3, b3 = lin(k3, HIDDEN, OUT_FEATURES)
    return (w1, b1, w2, b2, w3, b3)


def reference_forward(x, params_f32):
    """Pure-JAX f32 reference matching the PyTorch module."""
    w1, b1, w2, b2, w3, b3 = params_f32
    h = x.reshape(x.shape[0], IN_FEATURES)
    h = jnp.maximum(h @ w1 + b1, 0.0)
    h = jnp.maximum(h @ w2 + b2, 0.0)
    logits = h @ w3 + b3
    return jax.nn.softmax(logits, axis=1)


if __name__ == "__main__":
    key = jax.random.PRNGKey(0)
    pkey, xkey = jax.random.split(key)

    params_f32 = init_params(pkey)
    kernel_params = pack_params(params_f32)

    batch = 2
    x = jax.random.normal(xkey, (batch, 18, 20), dtype=jnp.float32)

    out = neural_network_forward(x, kernel_params)
    out = jax.block_until_ready(out)

    assert out.shape == (batch, OUT_FEATURES)
    # Rows sum to ~1 (bf16 output rounding introduces tiny error).
    assert jnp.allclose(jnp.sum(out, axis=1), 1.0, atol=1e-2), jnp.sum(out, axis=1)
    # Matches the f32 reference within bf16-matmul / bf16-output tolerance.
    ref = reference_forward(x, params_f32)
    assert jnp.allclose(out, ref, atol=2e-2, rtol=2e-2), jnp.max(jnp.abs(out - ref))

    print("KERNEL_OK")
</pallas_src>

<mosaic_0001>
module attributes {stable_mosaic.version = 11 : i64} {
  func.func @mlp_softmax_kernel(%arg0: i32, %arg1: memref<8x360xf32, #tpu.memory_space<vmem>>, %arg2: memref<384x512xbf16, #tpu.memory_space<vmem>>, %arg3: memref<1x512xf32, #tpu.memory_space<vmem>>, %arg4: memref<512x512xbf16, #tpu.memory_space<vmem>>, %arg5: memref<1x512xf32, #tpu.memory_space<vmem>>, %arg6: memref<512x128xbf16, #tpu.memory_space<vmem>>, %arg7: memref<1x128xf32, #tpu.memory_space<vmem>>, %arg8: memref<8x128xbf16, #tpu.memory_space<vmem>>, %arg9: memref<8x384xbf16, #tpu.memory_space<vmem>>) attributes {dimension_semantics = [#tpu.dimension_semantics<parallel>], iteration_bounds = array<i64: 1>, scalar_prefetch = 0 : i64, scratch_operands = 1 : i64, tpu.core_type = #tpu.core_type<tc>, window_params = [{transform_indices = @transform_0, window_bounds = array<i64: 8, 360>}, {pipeline_mode = #tpu.pipeline_mode<synchronous>, transform_indices = @transform_1, window_bounds = array<i64: 384, 512>}, {pipeline_mode = #tpu.pipeline_mode<synchronous>, transform_indices = @transform_2, window_bounds = array<i64: 1, 512>}, {pipeline_mode = #tpu.pipeline_mode<synchronous>, transform_indices = @transform_3, window_bounds = array<i64: 512, 512>}, {pipeline_mode = #tpu.pipeline_mode<synchronous>, transform_indices = @transform_4, window_bounds = array<i64: 1, 512>}, {pipeline_mode = #tpu.pipeline_mode<synchronous>, transform_indices = @transform_5, window_bounds = array<i64: 512, 128>}, {pipeline_mode = #tpu.pipeline_mode<synchronous>, transform_indices = @transform_6, window_bounds = array<i64: 1, 128>}, {transform_indices = @transform_7, window_bounds = array<i64: 8, 128>}]} {
    %c0 = arith.constant 0 : index
    %c0_0 = arith.constant 0 : index
    %0 = vector.load %arg1[%c0, %c0_0] : memref<8x360xf32, #tpu.memory_space<vmem>>, vector<8x360xf32>
    %1 = arith.truncf %0 : vector<8x360xf32> to vector<8x360xbf16>
    %c0_1 = arith.constant 0 : index
    %c0_2 = arith.constant 0 : index
    %2 = vector.load %arg9[%c0_1, %c0_2] : memref<8x384xbf16, #tpu.memory_space<vmem>>, vector<8x360xbf16>
    tpu.vector_store %arg9[%c0_1, %c0_2], %1 {strides = array<i32>} : memref<8x384xbf16, #tpu.memory_space<vmem>>, vector<8x360xbf16>,
    %cst = arith.constant 0.000000e+00 : bf16
    %3 = vector.broadcast %cst : bf16 to vector<8x24xbf16>
    %c0_3 = arith.constant 0 : index
    %c360 = arith.constant 360 : index
    %4 = vector.load %arg9[%c0_3, %c360] : memref<8x384xbf16, #tpu.memory_space<vmem>>, vector<8x24xbf16>
    tpu.vector_store %arg9[%c0_3, %c360], %3 {strides = array<i32>} : memref<8x384xbf16, #tpu.memory_space<vmem>>, vector<8x24xbf16>,
    %c0_4 = arith.constant 0 : index
    %c0_5 = arith.constant 0 : index
    %5 = vector.load %arg9[%c0_4, %c0_5] : memref<8x384xbf16, #tpu.memory_space<vmem>>, vector<8x384xbf16>
    %c0_6 = arith.constant 0 : index
    %c0_7 = arith.constant 0 : index
    %6 = vector.load %arg2[%c0_6, %c0_7] : memref<384x512xbf16, #tpu.memory_space<vmem>>, vector<384x512xbf16>
    %cst_8 = arith.constant dense<0.000000e+00> : vector<8x512xf32>
    %7 = tpu.matmul %5, %6, %cst_8 {dimension_numbers = #tpu.dot_dimension_numbers<[1], [0], [0], [1], [0, 0, 1, 1], [], []>} : vector<8x384xbf16>, vector<384x512xbf16>, vector<8x512xf32> -> vector<8x512xf32>
    %c0_9 = arith.constant 0 : index
    %c0_10 = arith.constant 0 : index
    %8 = vector.load %arg3[%c0_9, %c0_10] : memref<1x512xf32, #tpu.memory_space<vmem>>, vector<1x512xf32>
    %9 = vector.broadcast %8 : vector<1x512xf32> to vector<8x512xf32>
    %10 = arith.addf %7, %9 : vector<8x512xf32>
    %cst_11 = arith.constant 0.000000e+00 : f32
    %11 = vector.broadcast %cst_11 : f32 to vector<8x512xf32>
    %12 = arith.maximumf %10, %11 : vector<8x512xf32>
    %13 = arith.truncf %12 : vector<8x512xf32> to vector<8x512xbf16>
    %c0_12 = arith.constant 0 : index
    %c0_13 = arith.constant 0 : index
    %14 = vector.load %arg4[%c0_12, %c0_13] : memref<512x512xbf16, #tpu.memory_space<vmem>>, vector<512x512xbf16>
    %cst_14 = arith.constant dense<0.000000e+00> : vector<8x512xf32>
    %15 = tpu.matmul %13, %14, %cst_14 {dimension_numbers = #tpu.dot_dimension_numbers<[1], [0], [0], [1], [0, 0, 1, 1], [], []>} : vector<8x512xbf16>, vector<512x512xbf16>, vector<8x512xf32> -> vector<8x512xf32>
    %c0_15 = arith.constant 0 : index
    %c0_16 = arith.constant 0 : index
    %16 = vector.load %arg5[%c0_15, %c0_16] : memref<1x512xf32, #tpu.memory_space<vmem>>, vector<1x512xf32>
    %17 = vector.broadcast %16 : vector<1x512xf32> to vector<8x512xf32>
    %18 = arith.addf %15, %17 : vector<8x512xf32>
    %cst_17 = arith.constant 0.000000e+00 : f32
    %19 = vector.broadcast %cst_17 : f32 to vector<8x512xf32>
    %20 = arith.maximumf %18, %19 : vector<8x512xf32>
    %21 = arith.truncf %20 : vector<8x512xf32> to vector<8x512xbf16>
    %c0_18 = arith.constant 0 : index
    %c0_19 = arith.constant 0 : index
    %22 = vector.load %arg6[%c0_18, %c0_19] : memref<512x128xbf16, #tpu.memory_space<vmem>>, vector<512x128xbf16>
    %cst_20 = arith.constant dense<0.000000e+00> : vector<8x128xf32>
    %23 = tpu.matmul %21, %22, %cst_20 {dimension_numbers = #tpu.dot_dimension_numbers<[1], [0], [0], [1], [0, 0, 1, 1], [], []>} : vector<8x512xbf16>, vector<512x128xbf16>, vector<8x128xf32> -> vector<8x128xf32>
    %c0_21 = arith.constant 0 : index
    %c0_22 = arith.constant 0 : index
    %24 = vector.load %arg7[%c0_21, %c0_22] : memref<1x128xf32, #tpu.memory_space<vmem>>, vector<1x128xf32>
    %25 = vector.broadcast %24 : vector<1x128xf32> to vector<8x128xf32>
    %26 = arith.addf %23, %25 : vector<8x128xf32>
    %cst_23 = arith.constant dense<0xFF800000> : vector<8xf32>
    %27 = vector.multi_reduction <maximumf>, %26, %cst_23 [1] : vector<8x128xf32> to vector<8xf32>
    %28 = vector.shape_cast %27 : vector<8xf32> to vector<8x1xf32>
    %29 = vector.broadcast %28 : vector<8x1xf32> to vector<8x128xf32>
    %30 = arith.subf %26, %29 : vector<8x128xf32>
    %31 = math.exp %30 : vector<8x128xf32>
    %cst_24 = arith.constant dense<0.000000e+00> : vector<8xf32>
    %32 = vector.multi_reduction <add>, %31, %cst_24 [1] : vector<8x128xf32> to vector<8xf32>
    %33 = vector.shape_cast %32 : vector<8xf32> to vector<8x1xf32>
    %34 = tpu.reciprocal %33 : vector<8x1xf32> -> vector<8x1xf32>
    %35 = vector.broadcast %34 : vector<8x1xf32> to vector<8x128xf32>
    %36 = arith.mulf %31, %35 : vector<8x128xf32>
    %37 = arith.truncf %36 : vector<8x128xf32> to vector<8x128xbf16>
    %c0_25 = arith.constant 0 : index
    %c0_26 = arith.constant 0 : index
    %38 = vector.load %arg8[%c0_25, %c0_26] : memref<8x128xbf16, #tpu.memory_space<vmem>>, vector<8x128xbf16>
    tpu.vector_store %arg8[%c0_25, %c0_26], %37 {strides = array<i32>} : memref<8x128xbf16, #tpu.memory_space<vmem>>, vector<8x128xbf16>,
    return
  }
  func.func @transform_0(%arg0: i32) -> (i32, i32) {
    %c0_i32 = arith.constant 0 : i32
    %c0_i32_0 = arith.constant 0 : i32
    return %arg0, %c0_i32 : i32, i32
  }
  func.func @transform_1(%arg0: i32) -> (i32, i32) {
    %c0_i32 = arith.constant 0 : i32
    %c0_i32_0 = arith.constant 0 : i32
    %c0_i32_1 = arith.constant 0 : i32
    return %c0_i32, %c0_i32_0 : i32, i32
  }
  func.func @transform_2(%arg0: i32) -> (i32, i32) {
    %c0_i32 = arith.constant 0 : i32
    %c0_i32_0 = arith.constant 0 : i32
    %c0_i32_1 = arith.constant 0 : i32
    return %c0_i32, %c0_i32_0 : i32, i32
  }
  func.func @transform_3(%arg0: i32) -> (i32, i32) {
    %c0_i32 = arith.constant 0 : i32
    %c0_i32_0 = arith.constant 0 : i32
    %c0_i32_1 = arith.constant 0 : i32
    return %c0_i32, %c0_i32_0 : i32, i32
  }
  func.func @transform_4(%arg0: i32) -> (i32, i32) {
    %c0_i32 = arith.constant 0 : i32
    %c0_i32_0 = arith.constant 0 : i32
    %c0_i32_1 = arith.constant 0 : i32
    return %c0_i32, %c0_i32_0 : i32, i32
  }
  func.func @transform_5(%arg0: i32) -> (i32, i32) {
    %c0_i32 = arith.constant 0 : i32
    %c0_i32_0 = arith.constant 0 : i32
    %c0_i32_1 = arith.constant 0 : i32
    return %c0_i32, %c0_i32_0 : i32, i32
  }
  func.func @transform_6(%arg0: i32) -> (i32, i32) {
    %c0_i32 = arith.constant 0 : i32
    %c0_i32_0 = arith.constant 0 : i32
    %c0_i32_1 = arith.constant 0 : i32
    return %c0_i32, %c0_i32_0 : i32, i32
  }
  func.func @transform_7(%arg0: i32) -> (i32, i32) {
    %c0_i32 = arith.constant 0 : i32
    %c0_i32_0 = arith.constant 0 : i32
    return %arg0, %c0_i32 : i32, i32
  }
}

</mosaic_0001>

<bundles_post_ra>
// kernel: tpu_custom_call.1
= control target key start
LH: loop header
LB: loop body
LE: loop exit
PB: predicated region body
PF: predicated region fallthrough
CT: control target
= control target key end

     0   :  { %12 = vsyncpa [#allocation4], 0  ;;  %s3858_s0 = inlined_call_operand.hbm [shape: f32[8,360], index: 0, kind: input, shape index: {}]   ;;  %s3859_s1 = inlined_call_operand.hbm [shape: bf16[384,512], index: 1, kind: input, shape index: {}]   ;;  %s3860_s2 = inlined_call_operand.hbm [shape: f32[1,512], index: 2, kind: input, shape index: {}]   ;;  %s3861_s3 = inlined_call_operand.hbm [shape: bf16[512,512], index: 3, kind: input, shape index: {}]   ;;  %s3862_s4 = inlined_call_operand.hbm [shape: f32[1,512], index: 4, kind: input, shape index: {}]   ;;  %s3863_s5 = inlined_call_operand.hbm [shape: bf16[512,128], index: 5, kind: input, shape index: {}]   ;;  %s3864_s6 = inlined_call_operand.vmem [shape: f32[1,128], index: 6, kind: input, shape index: {}]   ;;  %s3865_s7 = inlined_call_operand.hbm [shape: bf16[8,128], index: 7, kind: output, shape index: {}]  }
   0x1   :  { %13 = vsyncpa [#allocation7], 0 }
   0x2   :  { %14 = vsyncpa [#allocation10], 0 }
   0x3   :  { %15 = vsyncpa [#allocation13], 0  ;;  %s32_s26 = sshll.u32 %s3859_s1, 4  ;;  %s33_s26 = int_to_ptr.hbm [resolvable:$true] %s32_s26 }
   0x4   :  { %16 = vsyncpa [#allocation5], 0  ;;  %s3714_s27 = smov [#allocation6]   ;;  %s56_s8 = sshll.u32 %s3861_s3, 4  ;;  %s57_s8 = int_to_ptr.hbm [resolvable:$true] %s56_s8 }
   0x5   :  { %s34_s28 = sshll.u32 %s3714_s27, 4  ;;  %s3715_s9 = smov 256   ;;  %s35_s28 = int_to_ptr.vmem [resolvable:$true] %s34_s28 }
   0x6   :  { %s3716_s10 = smov 16   ;;  %s3717_s11 = smov [#allocation9]  }
   0x7   :  { %40 = dma.hbm_to_vmem [thread:$0]  %s33_s26, 12288, %s35_s28, [#allocation7], %s3715_s9, %s3715_s9, %s3716_s10  }
   0x8   :  { %s58_s12 = sshll.u32 %s3717_s11, 4  ;;  %s22_s15 = sshll.u32 %s3858_s0, 4  ;;  %s59_s12 = int_to_ptr.vmem [resolvable:$true] %s58_s12  ;;  %s23_s15 = int_to_ptr.hbm [resolvable:$true] %s22_s15 }
   0x9   :  { %64 = dma.hbm_to_vmem [thread:$0]  %s57_s8, 16384, %s59_s12, [#allocation10], %s3715_s9, %s3715_s9, %s3716_s10  }
   0xa   :  { %s46_s17 = sshll.u32 %s3860_s2, 4  ;;  %s3718_s18 = smov [#allocation3]   ;;  %s47_s17 = int_to_ptr.hbm [resolvable:$true] %s46_s17 }
   0xb   :  { %s24_s19 = sshll.u32 %s3718_s18, 4  ;;  %s3719_s3 = smov [#allocation8]   ;;  %s25_s19 = int_to_ptr.vmem [resolvable:$true] %s24_s19 }
   0xc   :  { %27 = dma.hbm_to_vmem [thread:$0]  %s23_s15, 384, %s25_s19, [#allocation4]  }
   0xd   :  { %s48_s20 = sshll.u32 %s3719_s3, 4  ;;  %s70_s23 = sshll.u32 %s3862_s4, 4  ;;  %s49_s20 = int_to_ptr.vmem [resolvable:$true] %s48_s20  ;;  %s71_s23 = int_to_ptr.hbm [resolvable:$true] %s70_s23 }
   0xe   :  { %51 = dma.hbm_to_vmem [thread:$0]  %s47_s17, 64, %s49_s20, [#allocation7]  }
   0xf   :  { %s80_s25 = sshll.u32 %s3863_s5, 4  ;;  %s3720_s26 = smov [#allocation11]   ;;  %s81_s25 = int_to_ptr.hbm [resolvable:$true] %s80_s25 }
  0x10   :  { %s72_s2 = sshll.u32 %s3720_s26, 4  ;;  %s3721_s27 = smov [#allocation12]   ;;  %s73_s2 = int_to_ptr.vmem [resolvable:$true] %s72_s2 }
  0x11   :  { %75 = dma.hbm_to_vmem [thread:$0]  %s71_s23, 64, %s73_s2, [#allocation10]  }
  0x12   :  { %s82_s28 = sshll.u32 %s3721_s27, 4  ;;  %s3722_s29 = smov 64   ;;  %s83_s28 = int_to_ptr.vmem [resolvable:$true] %s82_s28 }
  0x13   :  { %s3723_s30 = smov 4  }
  0x14   :  { %88 = dma.hbm_to_vmem [thread:$0]  %s81_s25, 4096, %s83_s28, [#allocation13], %s3722_s29, %s3722_s29, %s3723_s30  }
  0x15   :  { %3704 = dma.done.wait [#allocation4], 384  }
  0x16   :  { %3705 = vsyncadd [#allocation4], 4294966912 }
  0x17   :  { %3706 = dma.done.wait [#allocation7], 12352  }
  0x18   :  { %3707 = vsyncadd [#allocation7], 4294954944 }
  0x19   :  { %3708 = dma.done.wait [#allocation10], 16448  }
  0x1a   :  { %3709 = vsyncadd [#allocation10], 4294950848 }
  0x1b   :  { %3710 = dma.done.wait [#allocation13], 4096  }
  0x1c   :  { %3711 = vsyncadd [#allocation13], 4294963200  ;;  %v2353_v0 = vld [vmem:[#allocation6 + $0xe0] sm:$0xf]  ;;  %v3293_v1 = vld [vmem:[#allocation6 + $0xec] sm:$0xf0] }
  0x1d   :  { %v2481_v2 = vld [vmem:[#allocation6 + $0x1e0] sm:$0xf]  ;;  %v2354_v3 = vor.u32 %v3293_v1, %v2353_v0  ;;  %v3325_v4 = vld [vmem:[#allocation6 + $0x1ec] sm:$0xf0]  ;;  %v3291_v9 = vld [vmem:[#allocation6 + $0xe4] sm:$0xf] }
  0x1e   :  { %v2609_v5 = vld [vmem:[#allocation6 + $0x2e0] sm:$0xf]  ;;  %v3357_v6 = vld [vmem:[#allocation6 + $0x2ec] sm:$0xf0]  ;;  %v2482_v7 = vor.u32 %v3325_v4, %v2481_v2  ;;  %v2355_v10 = vld [vmem:[#allocation6 + $0xf0] sm:$0xf0] }
  0x1f   :  { %v2610_v8 = vor.u32 %v3357_v6, %v2609_v5  ;;  %v2337_v11 = vld [vmem:[#allocation6 + $0xc0] sm:$0xf]  ;;  %725 = vmatpush.bf16.msra.mxu0 %v2354_v3  ;;  %v2358_v12 = vor.u32 %v3291_v9, %v2355_v10  ;;  %v3289_v13 = vld [vmem:[#allocation6 + $0xcc] sm:$0xf0]  ;;  %v3287_v20 = vld [vmem:[#allocation6 + $0xc4] sm:$0xf] }
  0x20   :  { %v2465_v14 = vld [vmem:[#allocation6 + $0x1c0] sm:$0xf]  ;;  %v3321_v15 = vld [vmem:[#allocation6 + $0x1cc] sm:$0xf0]  ;;  %738 = vmatpush.bf16.msra.mxu1 %v2482_v7  ;;  %v2338_v16 = vor.u32 %v3289_v13, %v2337_v11  ;;  %v2339_v22 = vld [vmem:[#allocation6 + $0xd0] sm:$0xf0] }
  0x21   :  { %751 = vmatpush.bf16.msra.mxu2 %v2610_v8  ;;  %v2466_v17 = vor.u32 %v3321_v15, %v2465_v14  ;;  %v2593_v18 = vld [vmem:[#allocation6 + $0x2c0] sm:$0xf]  ;;  %v3353_v19 = vld [vmem:[#allocation6 + $0x2cc] sm:$0xf0]  ;;  %764 = vmatpush.bf16.msra.mxu3 %v2358_v12  ;;  %v2342_v25 = vor.u32 %v3287_v20, %v2339_v22  ;;  %v3283_v31 = vld [vmem:[#allocation6 + $0xa4] sm:$0xf] }
  0x22   :  { %v2594_v21 = vor.u32 %v3353_v19, %v2593_v18  ;;  %v2321_v23 = vld [vmem:[#allocation6 + $0xa0] sm:$0xf]  ;;  %v3285_v24 = vld [vmem:[#allocation6 + $0xac] sm:$0xf0]  ;;  %v2323_v32 = vld [vmem:[#allocation6 + $0xb0] sm:$0xf0] }
  0x23   :  { %v2449_v26 = vld [vmem:[#allocation6 + $0x1a0] sm:$0xf]  ;;  %v3317_v27 = vld [vmem:[#allocation6 + $0x1ac] sm:$0xf0]  ;;  %726 = vmatpush.bf16.msra.mxu0 %v2338_v16  ;;  %v2322_v29 = vor.u32 %v3285_v24, %v2321_v23  ;;  %v2326_v38 = vor.u32 %v3283_v31, %v2323_v32  ;;  %v3279_v42 = vld [vmem:[#allocation6 + $0x84] sm:$0xf] }
  0x24   :  { %v2577_v28 = vld [vmem:[#allocation6 + $0x2a0] sm:$0xf]  ;;  %v3349_v30 = vld [vmem:[#allocation6 + $0x2ac] sm:$0xf0]  ;;  %739 = vmatpush.bf16.msra.mxu1 %v2466_v17  ;;  %v2450_v33 = vor.u32 %v3317_v27, %v2449_v26  ;;  %v2307_v43 = vld [vmem:[#allocation6 + $0x90] sm:$0xf0] }
  0x25   :  { %752 = vmatpush.bf16.msra.mxu2 %v2594_v21  ;;  %v2578_v34 = vor.u32 %v3349_v30, %v2577_v28  ;;  %v2305_v35 = vld [vmem:[#allocation6 + $0x80] sm:$0xf]  ;;  %v3281_v36 = vld [vmem:[#allocation6 + $0x8c] sm:$0xf0]  ;;  %765 = vmatpush.bf16.msra.mxu3 %v2342_v25  ;;  %v2310_v50 = vor.u32 %v3279_v42, %v2307_v43  ;;  %v3275_v54 = vld [vmem:[#allocation6 + $0x64] sm:$0xf] }
  0x26   :  { %v2433_v37 = vld [vmem:[#allocation6 + $0x180] sm:$0xf]  ;;  %v3313_v39 = vld [vmem:[#allocation6 + $0x18c] sm:$0xf0]  ;;  %v2306_v44 = vor.u32 %v3281_v36, %v2305_v35  ;;  %v2291_v55 = vld [vmem:[#allocation6 + $0x70] sm:$0xf0] }
  0x27   :  { %v2561_v40 = vld [vmem:[#allocation6 + $0x280] sm:$0xf]  ;;  %v3345_v41 = vld [vmem:[#allocation6 + $0x28c] sm:$0xf0]  ;;  %727 = vmatpush.bf16.msra.mxu0 %v2322_v29  ;;  %v2434_v45 = vor.u32 %v3313_v39, %v2433_v37  ;;  %v2294_v62 = vor.u32 %v3275_v54, %v2291_v55  ;;  %v3271_v2 = vld [vmem:[#allocation6 + $0x44] sm:$0xf] }
  0x28   :  { %740 = vmatpush.bf16.msra.mxu1 %v2450_v33  ;;  %v2562_v46 = vor.u32 %v3345_v41, %v2561_v40  ;;  %v2289_v47 = vld [vmem:[#allocation6 + $0x60] sm:$0xf]  ;;  %v3277_v48 = vld [vmem:[#allocation6 + $0x6c] sm:$0xf0]  ;;  %v2275_v3 = vld [vmem:[#allocation6 + $0x50] sm:$0xf0] }
  0x29   :  { %753 = vmatpush.bf16.msra.mxu2 %v2578_v34  ;;  %v2417_v49 = vld [vmem:[#allocation6 + $0x160] sm:$0xf]  ;;  %766 = vmatpush.bf16.msra.mxu3 %v2326_v38  ;;  %v3309_v51 = vld [vmem:[#allocation6 + $0x16c] sm:$0xf0]  ;;  %v2290_v56 = vor.u32 %v3277_v48, %v2289_v47  ;;  %vm122_vm0 = vcmask 846848   ;;  %v2278_v11 = vor.u32 %v3271_v2, %v2275_v3  ;;  %v118_v25 = vld [vmem:[#allocation3 + $0x10] sm:$0xff] }
  0x2a   :  { %v2545_v52 = vld [vmem:[#allocation6 + $0x260] sm:$0xf]  ;;  %v3341_v53 = vld [vmem:[#allocation6 + $0x26c] sm:$0xf0]  ;;  %v2418_v57 = vor.u32 %v3309_v51, %v2417_v49  ;;  %v3267_v14 = vld [vmem:[#allocation6 + $0x24] sm:$0xf]  ;;  %v120_v32 = vpack.c.bf16 %v118_v25, %v118_v25 }
  0x2b   :  { %728 = vmatpush.bf16.msra.mxu0 %v2306_v44  ;;  %v2546_v58 = vor.u32 %v3341_v53, %v2545_v52  ;;  %v2273_v59 = vld [vmem:[#allocation6 + $0x40] sm:$0xf]  ;;  %v3273_v60 = vld [vmem:[#allocation6 + $0x4c] sm:$0xf0]  ;;  %v2259_v15 = vld [vmem:[#allocation6 + $0x30] sm:$0xf0] }
  0x2c   :  { %741 = vmatpush.bf16.msra.mxu1 %v2434_v45  ;;  %v2401_v61 = vld [vmem:[#allocation6 + $0x140] sm:$0xf]  ;;  %v3305_v63 = vld [vmem:[#allocation6 + $0x14c] sm:$0xf0]  ;;  %v2274_v4 = vor.u32 %v3273_v60, %v2273_v59  ;;  %vm124_vm1 = vcmask 1044288   ;;  %v116_v26 = vld [vmem:[#allocation3] sm:$0xff]  ;;  %v2262_v28 = vor.u32 %v3267_v14, %v2259_v15 }
  0x2d   :  { %754 = vmatpush.bf16.msra.mxu2 %v2562_v46  ;;  %767 = vmatpush.bf16.msra.mxu3 %v2310_v50  ;;  %v2529_v0 = vld [vmem:[#allocation6 + $0x240] sm:$0xf]  ;;  %v3337_v1 = vld [vmem:[#allocation6 + $0x24c] sm:$0xf0]  ;;  %v2402_v6 = vor.u32 %v3305_v63, %v2401_v61  ;;  %v3263_v29 = vld [vmem:[#allocation6 + $0x4] sm:$0xf] }
  0x2e   :  { %v2257_v5 = vld [vmem:[#allocation6 + $0x20] sm:$0xf]  ;;  %v2530_v7 = vor.u32 %v3337_v1, %v2529_v0  ;;  %v3269_v8 = vld [vmem:[#allocation6 + $0x2c] sm:$0xf0]  ;;  %v2243_v30 = vld [vmem:[#allocation6 + $0x10] sm:$0xf0] }
  0x2f   :  { %729 = vmatpush.bf16.msra.mxu0 %v2290_v56  ;;  %v2385_v9 = vld [vmem:[#allocation6 + $0x120] sm:$0xf]  ;;  %v3301_v10 = vld [vmem:[#allocation6 + $0x12c] sm:$0xf0]  ;;  %v2258_v18 = vor.u32 %v3269_v8, %v2257_v5  ;;  %v3323_v31 = vld [vmem:[#allocation6 + $0x1e4] sm:$0xf]  ;;  %v2246_v47 = vor.u32 %v3263_v29, %v2243_v30 }
  0x30   :  { %742 = vmatpush.bf16.msra.mxu1 %v2418_v57  ;;  %v2513_v12 = vld [vmem:[#allocation6 + $0x220] sm:$0xf]  ;;  %v3333_v13 = vld [vmem:[#allocation6 + $0x22c] sm:$0xf0]  ;;  %v2386_v23 = vor.u32 %v3301_v10, %v2385_v9  ;;  %v2483_v34 = vld [vmem:[#allocation6 + $0x1f0] sm:$0xf0] }
  0x31   :  { %755 = vmatpush.bf16.msra.mxu2 %v2546_v58  ;;  %768 = vmatpush.bf16.msra.mxu3 %v2294_v62  ;;  %v2241_v16 = vld [vmem:[#allocation6] sm:$0xf]  ;;  %v3265_v17 = vld [vmem:[#allocation6 + $0xc] sm:$0xf0]  ;;  %v2514_v24 = vor.u32 %v3333_v13, %v2513_v12  ;;  %v3355_v35 = vld [vmem:[#allocation6 + $0x2e4] sm:$0xf]  ;;  %v2486_v48 = vor.u32 %v3323_v31, %v2483_v34 }
  0x32   :  { %v2369_v19 = vld [vmem:[#allocation6 + $0x100] sm:$0xf]  ;;  %v3297_v20 = vld [vmem:[#allocation6 + $0x10c] sm:$0xf0]  ;;  %v2611_v36 = vld [vmem:[#allocation6 + $0x2f0] sm:$0xf0]  ;;  %v2242_v37 = vor.u32 %v3265_v17, %v2241_v16 }
  0x33   :  { %730 = vmatpush.bf16.msra.mxu0 %v2274_v4  ;;  %v2497_v21 = vld [vmem:[#allocation6 + $0x200] sm:$0xf]  ;;  %v3329_v22 = vld [vmem:[#allocation6 + $0x20c] sm:$0xf0]  ;;  %v2361_v38 = vld [vmem:[#allocation6 + $0xe8] sm:$0xf]  ;;  %v2370_v41 = vor.u32 %v3297_v20, %v2369_v19  ;;  %v2614_v49 = vor.u32 %v3355_v35, %v2611_v36 }
  0x34   :  { %743 = vmatpush.bf16.msra.mxu1 %v2402_v6  ;;  %v117_v27 = vld [vmem:[#allocation3 + $0x8] sm:$0xff]  ;;  %v3294_v39 = vld [vmem:[#allocation6 + $0xf4] sm:$0xf0]  ;;  %123 = vst.msk [vmem:[#allocation2 + $0x8] sm:$0xf] %vm122_vm0, %v120_v32  ;;  %v2498_v42 = vor.u32 %v3329_v22, %v2497_v21  ;;  %v3724_v45 = vmov 0  }
  0x35   :  { %756 = vmatpush.bf16.msra.mxu2 %v2530_v7  ;;  %769 = vmatpush.bf16.msra.mxu3 %v2278_v11  ;;  %v119_v33 = vpack.c.bf16 %v117_v27, %v116_v26  ;;  %v2489_v43 = vld [vmem:[#allocation6 + $0x1e8] sm:$0xf]  ;;  %v3326_v44 = vld [vmem:[#allocation6 + $0x1f4] sm:$0xf0]  ;;  %125 = vst.msk [vmem:[#allocation2 + $0x8] sm:$0xf] %vm124_vm1, %v3724_v45  ;;  %v2362_v50 = vor.u32 %v3294_v39, %v2361_v38 }
  0x36   :  { %v3319_v51 = vld [vmem:[#allocation6 + $0x1c4] sm:$0xf]  ;;  %v2467_v52 = vld [vmem:[#allocation6 + $0x1d0] sm:$0xf0]  ;;  %v2490_v54 = vor.u32 %v3326_v44, %v2489_v43  ;;  %v2345_v57 = vld [vmem:[#allocation6 + $0xc8] sm:$0xf] }
  0x37   :  { %731 = vmatpush.bf16.msra.mxu0 %v2258_v18  ;;  %v236_v40 = vunpack.c.l.b16 %v119_v33  ;;  %v237_v46 = vunpack.c.h.b16 %v119_v33  ;;  %v3351_v53 = vld [vmem:[#allocation6 + $0x2c4] sm:$0xf]  ;;  %v2595_v56 = vld [vmem:[#allocation6 + $0x2d0] sm:$0xf0]  ;;  %v3290_v58 = vld [vmem:[#allocation6 + $0xd4] sm:$0xf0]  ;;  %v2470_v62 = vor.u32 %v3319_v51, %v2467_v52 }
  0x38   :  { %744 = vmatpush.bf16.msra.mxu1 %v2386_v23  ;;  %v2473_v59 = vld [vmem:[#allocation6 + $0x1c8] sm:$0xf]  ;;  %v3322_v60 = vld [vmem:[#allocation6 + $0x1d4] sm:$0xf0]  ;;  %v3315_v63 = vld [vmem:[#allocation6 + $0x1a4] sm:$0xf]  ;;  %v2598_v0 = vor.u32 %v3351_v53, %v2595_v56  ;;  %v2346_v1 = vor.u32 %v3290_v58, %v2345_v57 }
  0x39   :  { %757 = vmatpush.bf16.msra.mxu2 %v2514_v24  ;;  %770 = vmatpush.bf16.msra.mxu3 %v2262_v28  ;;  %v3786_v55 = vpack.c.b16 %v236_v40, %v236_v40  ;;  %v3788_v61 = vpack.c.b16 %v237_v46, %v237_v46  ;;  %v2451_v2 = vld [vmem:[#allocation6 + $0x1b0] sm:$0xf0]  ;;  %v3347_v3 = vld [vmem:[#allocation6 + $0x2a4] sm:$0xf]  ;;  %v2474_v6 = vor.u32 %v3322_v60, %v2473_v59  ;;  %v2329_v7 = vld [vmem:[#allocation6 + $0xa8] sm:$0xf] }
  0x3a   :  { %v2579_v4 = vld [vmem:[#allocation6 + $0x2b0] sm:$0xf0]  ;;  %v3286_v8 = vld [vmem:[#allocation6 + $0xb4] sm:$0xf0]  ;;  %v2457_v10 = vld [vmem:[#allocation6 + $0x1a8] sm:$0xf]  ;;  %v2454_v12 = vor.u32 %v3315_v63, %v2451_v2 }
  0x3b   :  { %732 = vmatpush.bf16.msra.mxu0 %v2242_v37  ;;  %v3318_v11 = vld [vmem:[#allocation6 + $0x1b4] sm:$0xf0]  ;;  %v2582_v14 = vor.u32 %v3347_v3, %v2579_v4  ;;  %v2330_v15 = vor.u32 %v3286_v8, %v2329_v7  ;;  %v3311_v16 = vld [vmem:[#allocation6 + $0x184] sm:$0xf]  ;;  %v2435_v17 = vld [vmem:[#allocation6 + $0x190] sm:$0xf0] }
  0x3c   :  { %745 = vmatpush.bf16.msra.mxu1 %v2370_v41  ;;  %v127_v5 = vld [vmem:[#allocation2 + $0x8] sm:$0xf]  ;;  %v2458_v19 = vor.u32 %v3318_v11, %v2457_v10  ;;  %v2563_v20 = vld [vmem:[#allocation6 + $0x290] sm:$0xf0]  ;;  %v2313_v21 = vld [vmem:[#allocation6 + $0x88] sm:$0xf]  ;;  %v2438_v25 = vor.u32 %v3311_v16, %v2435_v17 }
  0x3d   :  { %758 = vmatpush.bf16.msra.mxu2 %v2498_v42  ;;  %771 = vmatpush.bf16.msra.mxu3 %v2246_v47  ;;  %v238_v9 = vunpack.c.l.b16 %v127_v5  ;;  %v3343_v18 = vld [vmem:[#allocation6 + $0x284] sm:$0xf]  ;;  %v3282_v22 = vld [vmem:[#allocation6 + $0x94] sm:$0xf0]  ;;  %v2441_v23 = vld [vmem:[#allocation6 + $0x188] sm:$0xf] }
  0x3e   :  { %733 = vmatmul.bf16.vlgmr.msra.gmra.mxu0 %v3786_v55  ;;  %v3314_v24 = vld [vmem:[#allocation6 + $0x194] sm:$0xf0]  ;;  %v2566_v26 = vor.u32 %v3343_v18, %v2563_v20  ;;  %v2314_v27 = vor.u32 %v3282_v22, %v2313_v21  ;;  %v3307_v28 = vld [vmem:[#allocation6 + $0x164] sm:$0xf]  ;;  %v2419_v29 = vld [vmem:[#allocation6 + $0x170] sm:$0xf0] }
  0x3f   :  { %777 = vmatpush.bf16.msrb.mxu0 %v2486_v48  ;;  %746 = vmatmul.bf16.vlgmr.msra.gmra.mxu1 %v3788_v61  ;;  %v3793_v13 = vpack.c.b16 %v238_v9, %v238_v9  ;;  %v3339_v30 = vld [vmem:[#allocation6 + $0x264] sm:$0xf]  ;;  %v2442_v31 = vor.u32 %v3314_v24, %v2441_v23  ;;  %v2547_v32 = vld [vmem:[#allocation6 + $0x270] sm:$0xf0]  ;;  %v2297_v33 = vld [vmem:[#allocation6 + $0x68] sm:$0xf]  ;;  %v2422_v37 = vor.u32 %v3307_v28, %v2419_v29 }
  0x40   :  { %790 = vmatpush.bf16.msrb.mxu1 %v2614_v49  ;;  %772 = vmatmul.bf16.vlgmr.msra.gmra.mxu3 %v3786_v55  ;;  %v3278_v34 = vld [vmem:[#allocation6 + $0x74] sm:$0xf0]  ;;  %v2425_v35 = vld [vmem:[#allocation6 + $0x168] sm:$0xf]  ;;  %v2550_v38 = vor.u32 %v3339_v30, %v2547_v32  ;;  %v3303_v40 = vld [vmem:[#allocation6 + $0x144] sm:$0xf] }
  0x41   :  { %803 = vmatpush.bf16.msrb.mxu2 %v2362_v50  ;;  %816 = vmatpush.bf16.msrb.mxu3 %v2490_v54  ;;  %v3310_v36 = vld [vmem:[#allocation6 + $0x174] sm:$0xf0]  ;;  %v2298_v39 = vor.u32 %v3278_v34, %v2297_v33  ;;  %v2403_v41 = vld [vmem:[#allocation6 + $0x150] sm:$0xf0]  ;;  %v3335_v42 = vld [vmem:[#allocation6 + $0x244] sm:$0xf] }
  0x42   :  { %759 = vmatmul.bf16.vlgmr.msra.gmra.mxu2 %v3793_v13  ;;  %v2426_v43 = vor.u32 %v3310_v36, %v2425_v35  ;;  %v2531_v44 = vld [vmem:[#allocation6 + $0x250] sm:$0xf0]  ;;  %v2281_v45 = vld [vmem:[#allocation6 + $0x48] sm:$0xf]  ;;  %v3274_v46 = vld [vmem:[#allocation6 + $0x54] sm:$0xf0]  ;;  %v2406_v49 = vor.u32 %v3303_v40, %v2403_v41 }
  0x43   :  { %778 = vmatpush.bf16.msrb.mxu0 %v2470_v62  ;;  %v2409_v47 = vld [vmem:[#allocation6 + $0x148] sm:$0xf]  ;;  %v3306_v48 = vld [vmem:[#allocation6 + $0x154] sm:$0xf0]  ;;  %v2534_v50 = vor.u32 %v3335_v42, %v2531_v44  ;;  %v2282_v51 = vor.u32 %v3274_v46, %v2281_v45  ;;  %v3299_v52 = vld [vmem:[#allocation6 + $0x124] sm:$0xf] }
  0x44   :  { %791 = vmatpush.bf16.msrb.mxu1 %v2598_v0  ;;  %v2387_v53 = vld [vmem:[#allocation6 + $0x130] sm:$0xf0]  ;;  %v3331_v54 = vld [vmem:[#allocation6 + $0x224] sm:$0xf]  ;;  %v2410_v56 = vor.u32 %v3306_v48, %v2409_v47  ;;  %v2265_v58 = vld [vmem:[#allocation6 + $0x28] sm:$0xf] }
  0x45   :  { %804 = vmatpush.bf16.msrb.mxu2 %v2346_v1  ;;  %817 = vmatpush.bf16.msrb.mxu3 %v2474_v6  ;;  %v2515_v57 = vld [vmem:[#allocation6 + $0x230] sm:$0xf0]  ;;  %v3270_v59 = vld [vmem:[#allocation6 + $0x34] sm:$0xf0]  ;;  %v2393_v60 = vld [vmem:[#allocation6 + $0x128] sm:$0xf]  ;;  %v2390_v63 = vor.u32 %v3299_v52, %v2387_v53 }
  0x46   :  { %v3302_v62 = vld [vmem:[#allocation6 + $0x134] sm:$0xf0]  ;;  %v3295_v0 = vld [vmem:[#allocation6 + $0x104] sm:$0xf]  ;;  %v2371_v1 = vld [vmem:[#allocation6 + $0x110] sm:$0xf0]  ;;  %v2518_v2 = vor.u32 %v3331_v54, %v2515_v57  ;;  %v2266_v3 = vor.u32 %v3270_v59, %v2265_v58 }
  0x47   :  { %779 = vmatpush.bf16.msrb.mxu0 %v2454_v12  ;;  %v3327_v4 = vld [vmem:[#allocation6 + $0x204] sm:$0xf]  ;;  %v2499_v5 = vld [vmem:[#allocation6 + $0x210] sm:$0xf0]  ;;  %v2249_v6 = vld [vmem:[#allocation6 + $0x8] sm:$0xf]  ;;  %v2394_v7 = vor.u32 %v3302_v62, %v2393_v60 }
  0x48   :  { %792 = vmatpush.bf16.msrb.mxu1 %v2582_v14  ;;  %v3266_v8 = vld [vmem:[#allocation6 + $0x14] sm:$0xf0]  ;;  %v2377_v9 = vld [vmem:[#allocation6 + $0x108] sm:$0xf]  ;;  %v3292_v14 = vld [vmem:[#allocation6 + $0xec] sm:$0xf] }
  0x49   :  { %805 = vmatpush.bf16.msrb.mxu2 %v2330_v15  ;;  %818 = vmatpush.bf16.msrb.mxu3 %v2458_v19  ;;  %v3298_v10 = vld [vmem:[#allocation6 + $0x114] sm:$0xf0]  ;;  %v2617_v11 = vld [vmem:[#allocation6 + $0x2e8] sm:$0xf]  ;;  %v2374_v15 = vor.u32 %v3295_v0, %v2371_v1  ;;  %v2363_v16 = vld [vmem:[#allocation6 + $0xf8] sm:$0xf0]  ;;  %v2502_v19 = vor.u32 %v3327_v4, %v2499_v5  ;;  %v2250_v20 = vor.u32 %v3266_v8, %v2249_v6 }
  0x4a   :  { %v3358_v12 = vld [vmem:[#allocation6 + $0x2f4] sm:$0xf0]  ;;  %v3324_v17 = vld [vmem:[#allocation6 + $0x1ec] sm:$0xf]  ;;  %v2491_v18 = vld [vmem:[#allocation6 + $0x1f8] sm:$0xf0]  ;;  %v2378_v23 = vor.u32 %v3298_v10, %v2377_v9 }
  0x4b   :  { %780 = vmatpush.bf16.msrb.mxu0 %v2438_v25  ;;  %v3356_v21 = vld [vmem:[#allocation6 + $0x2ec] sm:$0xf]  ;;  %v2619_v22 = vld [vmem:[#allocation6 + $0x2f8] sm:$0xf0]  ;;  %v2618_v24 = vor.u32 %v3358_v12, %v2617_v11  ;;  %v2366_v25 = vor.u32 %v3292_v14, %v2363_v16  ;;  %v3354_v28 = vld [vmem:[#allocation6 + $0x2d4] sm:$0xf0] }
  0x4c   :  { %793 = vmatpush.bf16.msrb.mxu1 %v2566_v26  ;;  %v2494_v26 = vor.u32 %v3324_v17, %v2491_v18  ;;  %v3288_v29 = vld [vmem:[#allocation6 + $0xcc] sm:$0xf]  ;;  %v2622_v30 = vor.u32 %v3356_v21, %v2619_v22  ;;  %v2475_v33 = vld [vmem:[#allocation6 + $0x1d8] sm:$0xf0]  ;;  %v3350_v40 = vld [vmem:[#allocation6 + $0x2b4] sm:$0xf0] }
  0x4d   :  { %806 = vmatpush.bf16.msrb.mxu2 %v2314_v27  ;;  %819 = vmatpush.bf16.msrb.mxu3 %v2442_v31  ;;  %v2601_v27 = vld [vmem:[#allocation6 + $0x2c8] sm:$0xf]  ;;  %v2347_v31 = vld [vmem:[#allocation6 + $0xd8] sm:$0xf0]  ;;  %v3320_v32 = vld [vmem:[#allocation6 + $0x1cc] sm:$0xf] }
  0x4e   :  { %v3352_v34 = vld [vmem:[#allocation6 + $0x2cc] sm:$0xf]  ;;  %v2603_v35 = vld [vmem:[#allocation6 + $0x2d8] sm:$0xf0]  ;;  %v2602_v36 = vor.u32 %v3354_v28, %v2601_v27  ;;  %v3346_v52 = vld [vmem:[#allocation6 + $0x294] sm:$0xf0] }
  0x4f   :  { %781 = vmatpush.bf16.msrb.mxu0 %v2422_v37  ;;  %v2350_v37 = vor.u32 %v3288_v29, %v2347_v31  ;;  %v3284_v41 = vld [vmem:[#allocation6 + $0xac] sm:$0xf]  ;;  %v2606_v42 = vor.u32 %v3352_v34, %v2603_v35  ;;  %v2459_v45 = vld [vmem:[#allocation6 + $0x1b8] sm:$0xf0]  ;;  %v2553_v1 = vld [vmem:[#allocation6 + $0x268] sm:$0xf] }
  0x50   :  { %794 = vmatpush.bf16.msrb.mxu1 %v2550_v38  ;;  %v2478_v38 = vor.u32 %v3320_v32, %v2475_v33  ;;  %v3316_v44 = vld [vmem:[#allocation6 + $0x1ac] sm:$0xf]  ;;  %v2587_v47 = vld [vmem:[#allocation6 + $0x2b8] sm:$0xf0]  ;;  %v2537_v14 = vld [vmem:[#allocation6 + $0x248] sm:$0xf] }
  0x51   :  { %807 = vmatpush.bf16.msrb.mxu2 %v2298_v39  ;;  %820 = vmatpush.bf16.msrb.mxu3 %v2426_v43  ;;  %v2585_v39 = vld [vmem:[#allocation6 + $0x2a8] sm:$0xf]  ;;  %v2331_v43 = vld [vmem:[#allocation6 + $0xb8] sm:$0xf0]  ;;  %v3348_v46 = vld [vmem:[#allocation6 + $0x2ac] sm:$0xf] }
  0x52   :  { %v2586_v48 = vor.u32 %v3350_v40, %v2585_v39  ;;  %v3280_v53 = vld [vmem:[#allocation6 + $0x8c] sm:$0xf]  ;;  %v2590_v54 = vor.u32 %v3348_v46, %v2587_v47  ;;  %v2443_v58 = vld [vmem:[#allocation6 + $0x198] sm:$0xf0]  ;;  %v3334_v27 = vld [vmem:[#allocation6 + $0x234] sm:$0xf0] }
  0x53   :  { %782 = vmatpush.bf16.msrb.mxu0 %v2406_v49  ;;  %v2569_v49 = vld [vmem:[#allocation6 + $0x288] sm:$0xf]  ;;  %v3312_v57 = vld [vmem:[#allocation6 + $0x18c] sm:$0xf]  ;;  %v2571_v60 = vld [vmem:[#allocation6 + $0x298] sm:$0xf0] }
  0x54   :  { %795 = vmatpush.bf16.msrb.mxu1 %v2534_v50  ;;  %v2334_v50 = vor.u32 %v3284_v41, %v2331_v43  ;;  %v3344_v59 = vld [vmem:[#allocation6 + $0x28c] sm:$0xf]  ;;  %v2570_v62 = vor.u32 %v3346_v52, %v2569_v49  ;;  %v2446_v0 = vor.u32 %v3312_v57, %v2443_v58  ;;  %v2299_v5 = vld [vmem:[#allocation6 + $0x78] sm:$0xf0]  ;;  %v3330_v39 = vld [vmem:[#allocation6 + $0x214] sm:$0xf0] }
  0x55   :  { %808 = vmatpush.bf16.msrb.mxu2 %v2282_v51  ;;  %821 = vmatpush.bf16.msrb.mxu3 %v2410_v56  ;;  %v2462_v51 = vor.u32 %v3316_v44, %v2459_v45  ;;  %v2315_v56 = vld [vmem:[#allocation6 + $0x98] sm:$0xf0]  ;;  %v2574_v4 = vor.u32 %v3344_v59, %v2571_v60  ;;  %v3308_v6 = vld [vmem:[#allocation6 + $0x16c] sm:$0xf]  ;;  %v2737_v47 = vld [vmem:[#allocation9 + $0xe0] sm:$0xf] }
  0x56   :  { %v3340_v8 = vld [vmem:[#allocation6 + $0x26c] sm:$0xf]  ;;  %v2555_v9 = vld [vmem:[#allocation6 + $0x278] sm:$0xf0]  ;;  %v2721_v57 = vld [vmem:[#allocation9 + $0xc0] sm:$0xf] }
  0x57   :  { %783 = vmatpush.bf16.msrb.mxu0 %v2390_v63  ;;  %v2318_v63 = vor.u32 %v3280_v53, %v2315_v56  ;;  %v3272_v16 = vld [vmem:[#allocation6 + $0x4c] sm:$0xf]  ;;  %v2558_v17 = vor.u32 %v3340_v8, %v2555_v9  ;;  %v2283_v18 = vld [vmem:[#allocation6 + $0x58] sm:$0xf0]  ;;  %v3385_v58 = vld [vmem:[#allocation9 + $0xcc] sm:$0xf0] }
  0x58   :  { %796 = vmatpush.bf16.msrb.mxu1 %v2518_v2  ;;  %v3342_v2 = vld [vmem:[#allocation6 + $0x274] sm:$0xf0]  ;;  %v3336_v21 = vld [vmem:[#allocation6 + $0x24c] sm:$0xf]  ;;  %v2539_v22 = vld [vmem:[#allocation6 + $0x258] sm:$0xf0] }
  0x59   :  { %809 = vmatpush.bf16.msrb.mxu2 %v2266_v3  ;;  %822 = vmatpush.bf16.msrb.mxu3 %v2394_v7  ;;  %v3276_v3 = vld [vmem:[#allocation6 + $0x6c] sm:$0xf]  ;;  %v2427_v7 = vld [vmem:[#allocation6 + $0x178] sm:$0xf0]  ;;  %v2554_v10 = vor.u32 %v3342_v2, %v2553_v1  ;;  %v2542_v29 = vor.u32 %v3336_v21, %v2539_v22  ;;  %v2849_v60 = vld [vmem:[#allocation9 + $0x1c0] sm:$0xf] }
  0x5a   :  { %v2302_v11 = vor.u32 %v3276_v3, %v2299_v5  ;;  %v2430_v12 = vor.u32 %v3308_v6, %v2427_v7  ;;  %v3268_v28 = vld [vmem:[#allocation6 + $0x2c] sm:$0xf]  ;;  %v2395_v32 = vld [vmem:[#allocation6 + $0x138] sm:$0xf0]  ;;  %v3381_v1 = vld [vmem:[#allocation9 + $0xac] sm:$0xf0] }
  0x5b   :  { %784 = vmatpush.bf16.msrb.mxu0 %v2374_v15  ;;  %v3338_v15 = vld [vmem:[#allocation6 + $0x254] sm:$0xf0]  ;;  %v3300_v31 = vld [vmem:[#allocation6 + $0x12c] sm:$0xf]  ;;  %v2523_v34 = vld [vmem:[#allocation6 + $0x238] sm:$0xf0] }
  0x5c   :  { %797 = vmatpush.bf16.msrb.mxu1 %v2502_v19  ;;  %v3304_v19 = vld [vmem:[#allocation6 + $0x14c] sm:$0xf]  ;;  %v2251_v41 = vld [vmem:[#allocation6 + $0x18] sm:$0xf0]  ;;  %v2833_v3 = vld [vmem:[#allocation9 + $0x1a0] sm:$0xf] }
  0x5d   :  { %810 = vmatpush.bf16.msrb.mxu2 %v2250_v20  ;;  %823 = vmatpush.bf16.msrb.mxu3 %v2378_v23  ;;  %v2411_v20 = vld [vmem:[#allocation6 + $0x158] sm:$0xf0]  ;;  %v2538_v23 = vor.u32 %v3338_v15, %v2537_v14  ;;  %v3332_v33 = vld [vmem:[#allocation6 + $0x22c] sm:$0xf]  ;;  %v2689_v6 = vld [vmem:[#allocation9 + $0x80] sm:$0xf] }
  0x5e   :  { %785 = vmatmul.bf16.vlgmr.msrb.gmra.mxu0 %v3788_v61  ;;  %v3264_v40 = vld [vmem:[#allocation6 + $0xc] sm:$0xf]  ;;  %v2379_v44 = vld [vmem:[#allocation6 + $0x118] sm:$0xf0]  ;;  %v3377_v7 = vld [vmem:[#allocation9 + $0x8c] sm:$0xf0] }
  0x5f   :  { %829 = vmatpush.bf16.msra.mxu0 %v2618_v24  ;;  %798 = vmatmul.bf16.vlgmr.msrb.gmra.mxu1 %v3793_v13  ;;  %v2286_v24 = vor.u32 %v3272_v16, %v2283_v18  ;;  %v3296_v43 = vld [vmem:[#allocation6 + $0x10c] sm:$0xf]  ;;  %v2507_v46 = vld [vmem:[#allocation6 + $0x218] sm:$0xf0]  ;;  %v2254_v52 = vor.u32 %v3264_v40, %v2251_v41  ;;  %v2817_v9 = vld [vmem:[#allocation9 + $0x180] sm:$0xf] }
  0x60   :  { %842 = vmatpush.bf16.msra.mxu1 %v2366_v25  ;;  %811 = vmatmul.bf16.vlgmr.msrb.gmra.mxu2 %v3786_v55  ;;  %v2414_v25 = vor.u32 %v3304_v19, %v2411_v20  ;;  %v3328_v45 = vld [vmem:[#allocation6 + $0x20c] sm:$0xf]  ;;  %v2382_v53 = vor.u32 %v3296_v43, %v2379_v44  ;;  %v3373_v14 = vld [vmem:[#allocation9 + $0x6c] sm:$0xf0]  ;;  %v2801_v15 = vld [vmem:[#allocation9 + $0x160] sm:$0xf] }
  0x61   :  { %855 = vmatpush.bf16.msra.mxu2 %v2494_v26  ;;  %868 = vmatpush.bf16.msra.mxu3 %v2622_v30  ;;  %v2521_v26 = vld [vmem:[#allocation6 + $0x228] sm:$0xf]  ;;  %v2267_v30 = vld [vmem:[#allocation6 + $0x38] sm:$0xf0]  ;;  %v2785_v19 = vld [vmem:[#allocation9 + $0x140] sm:$0xf] }
  0x62   :  { %824 = vmatmul.bf16.vlgmr.msrb.gmra.mxu3 %v3788_v61  ;;  %v2522_v35 = vor.u32 %v3334_v27, %v2521_v26  ;;  %v3401_v20 = vld [vmem:[#allocation9 + $0x14c] sm:$0xf0]  ;;  %v2641_v22 = vld [vmem:[#allocation9 + $0x20] sm:$0xf]  ;;  %v3371_v41 = vld [vmem:[#allocation9 + $0x64] sm:$0xf] }
  0x63   :  { %830 = vmatpush.bf16.msra.mxu0 %v2602_v36  ;;  %v2505_v36 = vld [vmem:[#allocation6 + $0x208] sm:$0xf]  ;;  %v2625_v26 = vld [vmem:[#allocation9] sm:$0xf]  ;;  %v3361_v27 = vld [vmem:[#allocation9 + $0xc] sm:$0xf0] }
  0x64   :  { %843 = vmatpush.bf16.msra.mxu1 %v2350_v37  ;;  %v2270_v37 = vor.u32 %v3268_v28, %v2267_v30  ;;  %v2506_v49 = vor.u32 %v3330_v39, %v2505_v36  ;;  %v3387_v28 = vld [vmem:[#allocation9 + $0xe4] sm:$0xf]  ;;  %v2626_v30 = vor.u32 %v3361_v27, %v2625_v26  ;;  %v2707_v36 = vld [vmem:[#allocation9 + $0xb0] sm:$0xf0]  ;;  %v2769_v43 = vld [vmem:[#allocation9 + $0x120] sm:$0xf] }
  0x65   :  { %856 = vmatpush.bf16.msra.mxu2 %v2478_v38  ;;  %869 = vmatpush.bf16.msra.mxu3 %v2606_v42  ;;  %v2398_v38 = vor.u32 %v3300_v31, %v2395_v32  ;;  %v2526_v42 = vor.u32 %v3332_v33, %v2523_v34  ;;  %v3383_v32 = vld [vmem:[#allocation9 + $0xc4] sm:$0xf]  ;;  %v2723_v33 = vld [vmem:[#allocation9 + $0xd0] sm:$0xf0]  ;;  %v3397_v44 = vld [vmem:[#allocation9 + $0x12c] sm:$0xf0] }
  0x66   :  { %v2726_v34 = vor.u32 %v3383_v32, %v2723_v33  ;;  %v2691_v39 = vld [vmem:[#allocation9 + $0x90] sm:$0xf0]  ;;  %v3437_v26 = vld [vmem:[#allocation9 + $0x26c] sm:$0xf0]  ;;  %v3089_v27 = vld [vmem:[#allocation9 + $0x3a0] sm:$0xf] }
  0x67   :  { %831 = vmatpush.bf16.msra.mxu0 %v2586_v48  ;;  %v3389_v48 = vld [vmem:[#allocation9 + $0xec] sm:$0xf0]  ;;  %s2226_s11 = sshll.u32 %s3865_s7, 4  ;;  %s2227_s11 = int_to_ptr.hbm [resolvable:$true] %s2226_s11 }
  0x68   :  { %844 = vmatpush.bf16.msra.mxu1 %v2334_v50  ;;  %v2865_v50 = vld [vmem:[#allocation9 + $0x1e0] sm:$0xf]  ;;  %v2738_v56 = vor.u32 %v3389_v48, %v2737_v47  ;;  %v3367_v47 = vld [vmem:[#allocation9 + $0x44] sm:$0xf]  ;;  %v2659_v48 = vld [vmem:[#allocation9 + $0x50] sm:$0xf0] }
  0x69   :  { %857 = vmatpush.bf16.msra.mxu2 %v2462_v51  ;;  %870 = vmatpush.bf16.msra.mxu3 %v2590_v54  ;;  %v3421_v51 = vld [vmem:[#allocation9 + $0x1ec] sm:$0xf0]  ;;  %v2510_v54 = vor.u32 %v3328_v45, %v2507_v46  ;;  %v2770_v45 = vor.u32 %v3397_v44, %v2769_v43  ;;  %v3399_v43 = vld [vmem:[#allocation9 + $0x144] sm:$0xf]  ;;  %v2787_v44 = vld [vmem:[#allocation9 + $0x150] sm:$0xf0] }
  0x6a   :  { %v2866_v59 = vor.u32 %v3421_v51, %v2865_v50  ;;  %v3453_v50 = vld [vmem:[#allocation9 + $0x2ec] sm:$0xf0]  ;;  %v2662_v51 = vor.u32 %v3367_v47, %v2659_v48  ;;  %v2897_v47 = vld [vmem:[#allocation9 + $0x220] sm:$0xf] }
  0x6b   :  { %832 = vmatpush.bf16.msra.mxu0 %v2570_v62  ;;  %v3417_v62 = vld [vmem:[#allocation9 + $0x1cc] sm:$0xf0] }
  0x6c   :  { %845 = vmatpush.bf16.msra.mxu1 %v2318_v63  ;;  %v2722_v63 = vor.u32 %v3385_v58, %v2721_v57  ;;  %v2850_v2 = vor.u32 %v3417_v62, %v2849_v60  ;;  %v2643_v58 = vld [vmem:[#allocation9 + $0x30] sm:$0xf0]  ;;  %v3429_v48 = vld [vmem:[#allocation9 + $0x22c] sm:$0xf0] }
  0x6d   :  { %858 = vmatpush.bf16.msra.mxu2 %v2446_v0  ;;  %871 = vmatpush.bf16.msra.mxu3 %v2574_v4  ;;  %v2705_v0 = vld [vmem:[#allocation9 + $0xa0] sm:$0xf]  ;;  %v3413_v4 = vld [vmem:[#allocation9 + $0x1ac] sm:$0xf0]  ;;  %v2867_v60 = vld [vmem:[#allocation9 + $0x1f0] sm:$0xf0] }
  0x6e   :  { %v2706_v5 = vor.u32 %v3381_v1, %v2705_v0  ;;  %v2834_v8 = vor.u32 %v3413_v4, %v2833_v3  ;;  %v3449_v0 = vld [vmem:[#allocation9 + $0x2cc] sm:$0xf0]  ;;  %v3359_v3 = vld [vmem:[#allocation9 + $0x4] sm:$0xf]  ;;  %v2627_v4 = vld [vmem:[#allocation9 + $0x10] sm:$0xf0] }
  0x6f   :  { %833 = vmatpush.bf16.msra.mxu0 %v2554_v10  ;;  %v3409_v10 = vld [vmem:[#allocation9 + $0x18c] sm:$0xf0] }
  0x70   :  { %846 = vmatpush.bf16.msra.mxu1 %v2302_v11  ;;  %v2690_v11 = vor.u32 %v3377_v7, %v2689_v6  ;;  %v2851_v6 = vld [vmem:[#allocation9 + $0x1d0] sm:$0xf0] }
  0x71   :  { %859 = vmatpush.bf16.msra.mxu2 %v2430_v12  ;;  %872 = vmatpush.bf16.msra.mxu3 %v2558_v17  ;;  %v2673_v12 = vld [vmem:[#allocation9 + $0x60] sm:$0xf] }
  0x72   :  { %v2674_v16 = vor.u32 %v3373_v14, %v2673_v12  ;;  %v2657_v17 = vld [vmem:[#allocation9 + $0x40] sm:$0xf]  ;;  %v3485_v14 = vld [vmem:[#allocation9 + $0x3ec] sm:$0xf0] }
  0x73   :  { %834 = vmatpush.bf16.msra.mxu0 %v2538_v23  ;;  %v3365_v23 = vld [vmem:[#allocation9 + $0x2c] sm:$0xf0] }
  0x74   :  { %847 = vmatpush.bf16.msra.mxu1 %v2286_v24  ;;  %v2786_v24 = vor.u32 %v3401_v20, %v2785_v19  ;;  %v3481_v20 = vld [vmem:[#allocation9 + $0x3cc] sm:$0xf0] }
  0x75   :  { %860 = vmatpush.bf16.msra.mxu2 %v2414_v25  ;;  %873 = vmatpush.bf16.msra.mxu3 %v2542_v29  ;;  %v2642_v25 = vor.u32 %v3365_v23, %v2641_v22  ;;  %v2739_v29 = vld [vmem:[#allocation9 + $0xf0] sm:$0xf0] }
  0x76   :  { %v2742_v31 = vor.u32 %v3387_v28, %v2739_v29  ;;  %v2819_v22 = vld [vmem:[#allocation9 + $0x190] sm:$0xf0]  ;;  %v3477_v29 = vld [vmem:[#allocation9 + $0x3ac] sm:$0xf0] }
  0x77   :  { %835 = vmatpush.bf16.msra.mxu0 %v2522_v35  ;;  %v3379_v35 = vld [vmem:[#allocation9 + $0xa4] sm:$0xf]  ;;  %v3090_v32 = vor.u32 %v3477_v29, %v3089_v27 }
  0x78   :  { %848 = vmatpush.bf16.msra.mxu1 %v2270_v37  ;;  %v2710_v37 = vor.u32 %v3379_v35, %v2707_v36  ;;  %v2913_v35 = vld [vmem:[#allocation9 + $0x240] sm:$0xf]  ;;  %v3433_v36 = vld [vmem:[#allocation9 + $0x24c] sm:$0xf0] }
  0x79   :  { %861 = vmatpush.bf16.msra.mxu2 %v2398_v38  ;;  %874 = vmatpush.bf16.msra.mxu3 %v2526_v42  ;;  %v3375_v38 = vld [vmem:[#allocation9 + $0x84] sm:$0xf]  ;;  %v2675_v42 = vld [vmem:[#allocation9 + $0x70] sm:$0xf0] }
  0x7a   :  { %v2694_v40 = vor.u32 %v3375_v38, %v2691_v39  ;;  %v2678_v46 = vor.u32 %v3371_v41, %v2675_v42  ;;  %v2914_v38 = vor.u32 %v3433_v36, %v2913_v35  ;;  %v3473_v39 = vld [vmem:[#allocation9 + $0x38c] sm:$0xf0] }
  0x7b   :  { %836 = vmatpush.bf16.msra.mxu0 %v2506_v49  ;;  %v2993_v49 = vld [vmem:[#allocation9 + $0x2e0] sm:$0xf] }
  0x7c   :  { %849 = vmatpush.bf16.msra.mxu1 %v2254_v52  ;;  %v2994_v52 = vor.u32 %v3453_v50, %v2993_v49  ;;  %v3057_v49 = vld [vmem:[#allocation9 + $0x360] sm:$0xf]  ;;  %v2898_v50 = vor.u32 %v3429_v48, %v2897_v47  ;;  %v3435_v47 = vld [vmem:[#allocation9 + $0x264] sm:$0xf]  ;;  %v2931_v48 = vld [vmem:[#allocation9 + $0x270] sm:$0xf0] }
  0x7d   :  { %862 = vmatpush.bf16.msra.mxu2 %v2382_v53  ;;  %875 = vmatpush.bf16.msra.mxu3 %v2510_v54  ;;  %v2753_v53 = vld [vmem:[#allocation9 + $0x100] sm:$0xf]  ;;  %v3393_v54 = vld [vmem:[#allocation9 + $0x10c] sm:$0xf0] }
  0x7e   :  { %837 = vmatmul.bf16.vlgmr.msra.gmra.mxu0 %v3793_v13  ;;  %v2754_v57 = vor.u32 %v3393_v54, %v2753_v53  ;;  %v3395_v54 = vld [vmem:[#allocation9 + $0x124] sm:$0xf] }
  0x7f   :  { %1667 = vmatpush.bf16.msrb.mxu0 %v2738_v56  ;;  %850 = vmatmul.bf16.vlgmr.msra.gmra.mxu1 %v3786_v55  ;;  %v2818_v55 = vor.u32 %v3409_v10, %v2817_v9  ;;  %v3363_v56 = vld [vmem:[#allocation9 + $0x24] sm:$0xf]  ;;  %v2961_v9 = vld [vmem:[#allocation9 + $0x2a0] sm:$0xf]  ;;  %v3445_v10 = vld [vmem:[#allocation9 + $0x2ac] sm:$0xf0] }
  0x80   :  { %1680 = vmatpush.bf16.msrb.mxu1 %v2866_v59  ;;  %863 = vmatmul.bf16.vlgmr.msra.gmra.mxu2 %v3788_v61  ;;  %v3405_v61 = vld [vmem:[#allocation9 + $0x16c] sm:$0xf0]  ;;  %v3419_v59 = vld [vmem:[#allocation9 + $0x1e4] sm:$0xf]  ;;  %v2646_v1 = vor.u32 %v3363_v56, %v2643_v58  ;;  %v2962_v12 = vor.u32 %v3445_v10, %v2961_v9  ;;  %v2771_v56 = vld [vmem:[#allocation9 + $0x130] sm:$0xf0] }
  0x81   :  { %876 = vmatmul.bf16.vlgmr.msra.gmra.mxu3 %v3793_v13  ;;  %v3369_v13 = vld [vmem:[#allocation9 + $0x4c] sm:$0xf0]  ;;  %v2802_v18 = vor.u32 %v3405_v61, %v2801_v15  ;;  %1693 = vmatpush.bf16.msrb.mxu2 %v2994_v52  ;;  %v2870_v62 = vor.u32 %v3419_v59, %v2867_v60  ;;  %v2835_v15 = vld [vmem:[#allocation9 + $0x1b0] sm:$0xf0]  ;;  %v2881_v58 = vld [vmem:[#allocation9 + $0x200] sm:$0xf] }
  0x82   :  { %v2658_v21 = vor.u32 %v3369_v13, %v2657_v17  ;;  %v2945_v17 = vld [vmem:[#allocation9 + $0x280] sm:$0xf]  ;;  %v3441_v13 = vld [vmem:[#allocation9 + $0x28c] sm:$0xf0] }
  0x83   :  { %1668 = vmatpush.bf16.msrb.mxu0 %v2722_v63  ;;  %v2977_v63 = vld [vmem:[#allocation9 + $0x2c0] sm:$0xf]  ;;  %v2946_v19 = vor.u32 %v3441_v13, %v2945_v17  ;;  %v3425_v59 = vld [vmem:[#allocation9 + $0x20c] sm:$0xf0]  ;;  %v2745_v17 = vld [vmem:[#allocation9 + $0xe8] sm:$0xf] }
  0x84   :  { %1681 = vmatpush.bf16.msrb.mxu1 %v2850_v2  ;;  %v2978_v2 = vor.u32 %v3449_v0, %v2977_v63  ;;  %v3041_v60 = vld [vmem:[#allocation9 + $0x340] sm:$0xf]  ;;  %v2882_v63 = vor.u32 %v3425_v59, %v2881_v58  ;;  %v3465_v0 = vld [vmem:[#allocation9 + $0x34c] sm:$0xf0]  ;;  %v3390_v13 = vld [vmem:[#allocation9 + $0xf4] sm:$0xf0] }
  0x85   :  { %v3431_v58 = vld [vmem:[#allocation9 + $0x244] sm:$0xf]  ;;  %v2915_v59 = vld [vmem:[#allocation9 + $0x250] sm:$0xf0] }
  0x86   :  { %1694 = vmatpush.bf16.msrb.mxu2 %v2978_v2  ;;  %v2995_v2 = vld [vmem:[#allocation9 + $0x2f0] sm:$0xf0] }
  0x87   :  { %1669 = vmatpush.bf16.msrb.mxu0 %v2706_v5  ;;  %v3415_v5 = vld [vmem:[#allocation9 + $0x1c4] sm:$0xf] }
  0x88   :  { %1682 = vmatpush.bf16.msrb.mxu1 %v2834_v8  ;;  %v2854_v7 = vor.u32 %v3415_v5, %v2851_v6  ;;  %v2630_v8 = vor.u32 %v3359_v3, %v2627_v4  ;;  %v3042_v5 = vor.u32 %v3465_v0, %v3041_v60  ;;  %v3471_v60 = vld [vmem:[#allocation9 + $0x384] sm:$0xf]  ;;  %v3374_v0 = vld [vmem:[#allocation9 + $0x74] sm:$0xf0] }
  0x8a   :  { %1695 = vmatpush.bf16.msrb.mxu2 %v2962_v12  ;;  %v3461_v12 = vld [vmem:[#allocation9 + $0x32c] sm:$0xf0] }
  0x8b   :  { %1670 = vmatpush.bf16.msrb.mxu0 %v2690_v11  ;;  %v3121_v11 = vld [vmem:[#allocation9 + $0x3e0] sm:$0xf] }
  0x8c   :  { %1683 = vmatpush.bf16.msrb.mxu1 %v2818_v55  ;;  %v3411_v55 = vld [vmem:[#allocation9 + $0x1a4] sm:$0xf]  ;;  %v3122_v61 = vor.u32 %v3485_v14, %v3121_v11  ;;  %v3025_v11 = vld [vmem:[#allocation9 + $0x320] sm:$0xf] }
  0x8e   :  { %1706 = vmatpush.bf16.msrb.mxu3 %v3122_v61  ;;  %1696 = vmatpush.bf16.msrb.mxu2 %v2946_v19  ;;  %v2979_v61 = vld [vmem:[#allocation9 + $0x2d0] sm:$0xf0] }
  0x8f   :  { %1671 = vmatpush.bf16.msrb.mxu0 %v2674_v16  ;;  %v2838_v16 = vor.u32 %v3411_v55, %v2835_v15  ;;  %v3026_v55 = vor.u32 %v3461_v12, %v3025_v11  ;;  %v3447_v15 = vld [vmem:[#allocation9 + $0x2c4] sm:$0xf]  ;;  %v3370_v11 = vld [vmem:[#allocation9 + $0x54] sm:$0xf0] }
  0x90   :  { %1684 = vmatpush.bf16.msrb.mxu1 %v2802_v18  ;;  %v3105_v18 = vld [vmem:[#allocation9 + $0x3c0] sm:$0xf] }
  0x91   :  { %v3106_v23 = vor.u32 %v3481_v20, %v3105_v18  ;;  %v2982_v18 = vor.u32 %v3447_v15, %v2979_v61  ;;  %v2729_v20 = vld [vmem:[#allocation9 + $0xc8] sm:$0xf]  ;;  %v3422_v61 = vld [vmem:[#allocation9 + $0x1f4] sm:$0xf0] }
  0x92   :  { %v2873_v15 = vld [vmem:[#allocation9 + $0x1e8] sm:$0xf] }
  0x93   :  { %1672 = vmatpush.bf16.msrb.mxu0 %v2658_v21  ;;  %v3407_v21 = vld [vmem:[#allocation9 + $0x184] sm:$0xf]  ;;  %1707 = vmatpush.bf16.msrb.mxu3 %v3106_v23 }
  0x94   :  { %1685 = vmatpush.bf16.msrb.mxu1 %v2786_v24  ;;  %v2822_v24 = vor.u32 %v3407_v21, %v2819_v22  ;;  %v3009_v21 = vld [vmem:[#allocation9 + $0x300] sm:$0xf]  ;;  %v2746_v22 = vor.u32 %v3390_v13, %v2745_v17  ;;  %v2649_v17 = vld [vmem:[#allocation9 + $0x28] sm:$0xf] }
  0x97   :  { %1673 = vmatpush.bf16.msrb.mxu0 %v2642_v25  ;;  %v2929_v25 = vld [vmem:[#allocation9 + $0x260] sm:$0xf]  ;;  %1708 = vmatpush.bf16.msrb.mxu3 %v3090_v32  ;;  %v3123_v32 = vld [vmem:[#allocation9 + $0x3f0] sm:$0xf0] }
  0x98   :  { %1686 = vmatpush.bf16.msrb.mxu1 %v2770_v45  ;;  %v2930_v28 = vor.u32 %v3437_v26, %v2929_v25  ;;  %v3443_v25 = vld [vmem:[#allocation9 + $0x2a4] sm:$0xf]  ;;  %v2963_v26 = vld [vmem:[#allocation9 + $0x2b0] sm:$0xf0] }
  0x9a   :  { %1697 = vmatpush.bf16.msrb.mxu2 %v2930_v28  ;;  %v3386_v28 = vld [vmem:[#allocation9 + $0xd4] sm:$0xf0] }
  0x9b   :  { %1674 = vmatpush.bf16.msrb.mxu0 %v2626_v30  ;;  %v3403_v30 = vld [vmem:[#allocation9 + $0x164] sm:$0xf]  ;;  %v2730_v35 = vor.u32 %v3386_v28, %v2729_v20  ;;  %v2883_v20 = vld [vmem:[#allocation9 + $0x210] sm:$0xf0] }
  0x9c   :  { %1687 = vmatpush.bf16.msrb.mxu1 %v2754_v57  ;;  %v2774_v57 = vor.u32 %v3395_v54, %v2771_v56 }
  0x9e   :  { %1698 = vmatpush.bf16.msrb.mxu2 %v2914_v38  ;;  %v2947_v38 = vld [vmem:[#allocation9 + $0x290] sm:$0xf0] }
  0x9f   :  { %1719 = vmatpush.bf16.msra.mxu0 %v2742_v31  ;;  %v2803_v31 = vld [vmem:[#allocation9 + $0x170] sm:$0xf0] }
  0xa0   :  { %1732 = vmatpush.bf16.msra.mxu1 %v2870_v62  ;;  %v2806_v33 = vor.u32 %v3403_v30, %v2803_v31  ;;  %v2966_v30 = vor.u32 %v3443_v25, %v2963_v26  ;;  %v3483_v31 = vld [vmem:[#allocation9 + $0x3e4] sm:$0xf]  ;;  %v3043_v25 = vld [vmem:[#allocation9 + $0x350] sm:$0xf0] }
  0xa2   :  { %1699 = vmatpush.bf16.msrb.mxu2 %v2898_v50  ;;  %v2697_v50 = vld [vmem:[#allocation9 + $0x88] sm:$0xf] }
  0xa3   :  { %1720 = vmatpush.bf16.msra.mxu0 %v2726_v34  ;;  %v3804_v34 = vld [vmem:[#allocation8] sm:$0xf] }
  0xa4   :  { %1733 = vmatpush.bf16.msra.mxu1 %v2854_v7  ;;  %v3391_v7 = vld [vmem:[#allocation9 + $0x104] sm:$0xf] }
  0xa6   :  { %1700 = vmatpush.bf16.msrb.mxu2 %v2882_v63  ;;  %v2681_v63 = vld [vmem:[#allocation9 + $0x68] sm:$0xf] }
  0xa7   :  { %1721 = vmatpush.bf16.msra.mxu0 %v2710_v37  ;;  %v3073_v37 = vld [vmem:[#allocation9 + $0x380] sm:$0xf] }
  0xa8   :  { %1734 = vmatpush.bf16.msra.mxu1 %v2838_v16  ;;  %v3074_v42 = vor.u32 %v3473_v39, %v3073_v37  ;;  %v3439_v37 = vld [vmem:[#allocation9 + $0x284] sm:$0xf] }
  0xa9   :  { %v3479_v39 = vld [vmem:[#allocation9 + $0x3c4] sm:$0xf] }
  0xaa   :  { %1709 = vmatpush.bf16.msrb.mxu3 %v3074_v42  ;;  %v2950_v42 = vor.u32 %v3439_v37, %v2947_v38  ;;  %v3459_v37 = vld [vmem:[#allocation9 + $0x324] sm:$0xf]  ;;  %v3027_v38 = vld [vmem:[#allocation9 + $0x330] sm:$0xf0] }
  0xab   :  { %1722 = vmatpush.bf16.msra.mxu0 %v2694_v40  ;;  %v226_v40 = vperm.slane %v3804_v34, 0 }
  0xac   :  { %1735 = vmatpush.bf16.msra.mxu1 %v2822_v24  ;;  %v3457_v24 = vld [vmem:[#allocation9 + $0x30c] sm:$0xf0] }
  0xad   :  { %v3010_v29 = vor.u32 %v3457_v24, %v3009_v21  ;;  %v3366_v21 = vld [vmem:[#allocation9 + $0x34] sm:$0xf0]  ;;  %v3463_v24 = vld [vmem:[#allocation9 + $0x344] sm:$0xf] }
  0xaf   :  { %1723 = vmatpush.bf16.msra.mxu0 %v2678_v46  ;;  %v2790_v46 = vor.u32 %v3399_v43, %v2787_v44  ;;  %v3107_v43 = vld [vmem:[#allocation9 + $0x3d0] sm:$0xf0] }
  0xb0   :  { %1736 = vmatpush.bf16.msra.mxu1 %v2806_v33  ;;  %v3126_v33 = vor.u32 %v3483_v31, %v3123_v32  ;;  %v3110_v44 = vor.u32 %v3479_v39, %v3107_v43  ;;  %v3046_v31 = vor.u32 %v3463_v24, %v3043_v25  ;;  %v2633_v39 = vld [vmem:[#allocation9 + $0x8] sm:$0xf]  ;;  %v2747_v43 = vld [vmem:[#allocation9 + $0xf8] sm:$0xf0]  ;;  %v3454_v24 = vld [vmem:[#allocation9 + $0x2f4] sm:$0xf0] }
  0xb1   :  { %v2667_v25 = vld [vmem:[#allocation9 + $0x58] sm:$0xf0] }
  0xb3   :  { %1724 = vmatpush.bf16.msra.mxu0 %v2662_v51  ;;  %v3469_v51 = vld [vmem:[#allocation9 + $0x36c] sm:$0xf0] }
  0xb4   :  { %1737 = vmatpush.bf16.msra.mxu1 %v2790_v46  ;;  %v3058_v53 = vor.u32 %v3469_v51, %v3057_v49  ;;  %v3475_v49 = vld [vmem:[#allocation9 + $0x3a4] sm:$0xf]  ;;  %v3378_v51 = vld [vmem:[#allocation9 + $0x94] sm:$0xf0] }
  0xb5   :  { %v2698_v56 = vor.u32 %v3378_v51, %v2697_v50 }
  0xb6   :  { %1710 = vmatpush.bf16.msrb.mxu3 %v3058_v53  ;;  %v3091_v53 = vld [vmem:[#allocation9 + $0x3b0] sm:$0xf0] }
  0xb7   :  { %1725 = vmatpush.bf16.msra.mxu0 %v2646_v1  ;;  %v3451_v1 = vld [vmem:[#allocation9 + $0x2e4] sm:$0xf]  ;;  %v3094_v54 = vor.u32 %v3475_v49, %v3091_v53  ;;  %v3011_v49 = vld [vmem:[#allocation9 + $0x310] sm:$0xf0]  ;;  %v2731_v53 = vld [vmem:[#allocation9 + $0xd8] sm:$0xf0] }
  0xb8   :  { %1738 = vmatpush.bf16.msra.mxu1 %v2774_v57  ;;  %v2998_v6 = vor.u32 %v3451_v1, %v2995_v2  ;;  %v2918_v1 = vor.u32 %v3431_v58, %v2915_v59  ;;  %v3075_v2 = vld [vmem:[#allocation9 + $0x390] sm:$0xf0] }
  0xba   :  { %1711 = vmatpush.bf16.msrb.mxu3 %v3042_v5  ;;  %1745 = vmatpush.bf16.msra.mxu2 %v2998_v6  ;;  %v2682_v6 = vor.u32 %v3374_v0, %v2681_v63  ;;  %v3380_v0 = vld [vmem:[#allocation9 + $0xac] sm:$0xf] }
  0xbb   :  { %1726 = vmatpush.bf16.msra.mxu0 %v2630_v8  ;;  %v734_v41 = vpop.f32.mrf.mxu0  ;;  %v2755_v8 = vld [vmem:[#allocation9 + $0x110] sm:$0xf0] }
  0xbc   :  { %v747_v45 = vpop.f32.mrf.mxu1  ;;  %v735_v52 = vadd.f32 %v734_v41, %v226_v40  ;;  %v2758_v10 = vor.u32 %v3391_v7, %v2755_v8  ;;  %v2713_v40 = vld [vmem:[#allocation9 + $0xa8] sm:$0xf]  ;;  %v3382_v41 = vld [vmem:[#allocation9 + $0xb4] sm:$0xf0]  ;;  %v3427_v8 = vld [vmem:[#allocation9 + $0x224] sm:$0xf] }
  0xbd   :  { %v2714_v46 = vor.u32 %v3382_v41, %v2713_v40  ;;  %v3362_v40 = vld [vmem:[#allocation9 + $0x14] sm:$0xf0] }
  0xbe   :  { %v748_v3 = vadd.f32 %v747_v45, %v735_v52  ;;  %1739 = vmatpush.bf16.msra.mxu1 %v2758_v10  ;;  %1712 = vmatpush.bf16.msrb.mxu3 %v3026_v55  ;;  %v227_v45 = vperm.slane %v3804_v34, 1  ;;  %v2934_v52 = vor.u32 %v3435_v47, %v2931_v48  ;;  %v3467_v10 = vld [vmem:[#allocation9 + $0x364] sm:$0xf]  ;;  %v2634_v47 = vor.u32 %v3362_v40, %v2633_v39  ;;  %v3450_v39 = vld [vmem:[#allocation9 + $0x2d4] sm:$0xf0] }
  0xbf   :  { %1746 = vmatpush.bf16.msra.mxu2 %v2982_v18  ;;  %v3455_v48 = vld [vmem:[#allocation9 + $0x304] sm:$0xf]  ;;  %v3364_v40 = vld [vmem:[#allocation9 + $0x2c] sm:$0xf] }
  0xc0   :  { %v3014_v58 = vor.u32 %v3455_v48, %v3011_v49 }
  0xc2   :  { %1713 = vmatpush.bf16.msrb.mxu3 %v3010_v29  ;;  %v2857_v29 = vld [vmem:[#allocation9 + $0x1c8] sm:$0xf] }
  0xc3   :  { %v3807_v62 = vpop.f32.mrf.mxu3  ;;  %v736_v4 = vpop.f32.mrf.mxu0  ;;  %1747 = vmatpush.bf16.msra.mxu2 %v2966_v30  ;;  %v3418_v30 = vld [vmem:[#allocation9 + $0x1d4] sm:$0xf0] }
  0xc4   :  { %v749_v9 = vpop.f32.mrf.mxu1  ;;  %v774_v57 = vadd.f32 %v3807_v62, %v227_v45  ;;  %v2665_v62 = vld [vmem:[#allocation9 + $0x48] sm:$0xf]  ;;  %v2858_v41 = vor.u32 %v3418_v30, %v2857_v29  ;;  %v3414_v45 = vld [vmem:[#allocation9 + $0x1b4] sm:$0xf0] }
  0xc5   :  { %v760_v14 = vpop.f32.mrf.mxu2  ;;  %v2899_v9 = vld [vmem:[#allocation9 + $0x230] sm:$0xf0]  ;;  %v2666_v18 = vor.u32 %v3370_v11, %v2665_v62  ;;  %v3394_v29 = vld [vmem:[#allocation9 + $0x114] sm:$0xf0] }
  0xc6   :  { %v761_v16 = vadd.f32 %v760_v14, %v748_v3  ;;  %1758 = vmatpush.bf16.msra.mxu3 %v3126_v33  ;;  %v3078_v3 = vor.u32 %v3471_v60, %v3075_v2  ;;  %v2902_v12 = vor.u32 %v3427_v8, %v2899_v9  ;;  %v3059_v14 = vld [vmem:[#allocation9 + $0x370] sm:$0xf0]  ;;  %v2809_v2 = vld [vmem:[#allocation9 + $0x168] sm:$0xf]  ;;  %v2699_v8 = vld [vmem:[#allocation9 + $0x98] sm:$0xf0] }
  0xc7   :  { %1748 = vmatpush.bf16.msra.mxu2 %v2950_v42  ;;  %v3388_v42 = vld [vmem:[#allocation9 + $0xec] sm:$0xf]  ;;  %v2793_v9 = vld [vmem:[#allocation9 + $0x148] sm:$0xf] }
  0xc8   :  { %v881_v19 = vmax.f32 %v761_v16, 0.0  ;;  %v3062_v16 = vor.u32 %v3467_v10, %v3059_v14  ;;  %v2750_v50 = vor.u32 %v3388_v42, %v2747_v43  ;;  %v3402_v10 = vld [vmem:[#allocation9 + $0x154] sm:$0xf0]  ;;  %v3372_v14 = vld [vmem:[#allocation9 + $0x6c] sm:$0xf] }
  0xca   :  { %v3809_v27 = vpack.c.bf16 %v881_v19, %v881_v19  ;;  %1759 = vmatpush.bf16.msra.mxu3 %v3110_v44  ;;  %v3423_v19 = vld [vmem:[#allocation9 + $0x204] sm:$0xf]  ;;  %v2841_v44 = vld [vmem:[#allocation9 + $0x1a8] sm:$0xf] }
  0xcb   :  { %v775_v23 = vpop.f32.mrf.mxu3  ;;  %1749 = vmatpush.bf16.msra.mxu2 %v2934_v52  ;;  %v2842_v51 = vor.u32 %v3414_v45, %v2841_v44  ;;  %v3384_v52 = vld [vmem:[#allocation9 + $0xcc] sm:$0xf]  ;;  %v2859_v45 = vld [vmem:[#allocation9 + $0x1d8] sm:$0xf0] }
  0xcc   :  { %1675 = vmatmul.bf16.vlgmr.msrb.gmra.mxu0 %v3809_v27  ;;  %v2886_v23 = vor.u32 %v3423_v19, %v2883_v20  ;;  %v2734_v60 = vor.u32 %v3384_v52, %v2731_v53  ;;  %v3416_v44 = vld [vmem:[#allocation9 + $0x1cc] sm:$0xf]  ;;  %v2969_v53 = vld [vmem:[#allocation9 + $0x2a8] sm:$0xf] }
  0xcd   :  { %1771 = vmatpush.bf16.msrb.mxu0 %v2746_v22  ;;  %v762_v36 = vpop.f32.mrf.mxu2  ;;  %v2874_v22 = vor.u32 %v3422_v61, %v2873_v15  ;;  %v2777_v15 = vld [vmem:[#allocation9 + $0x128] sm:$0xf]  ;;  %v3398_v61 = vld [vmem:[#allocation9 + $0x134] sm:$0xf0]  ;;  %v3360_v52 = vld [vmem:[#allocation9 + $0xc] sm:$0xf] }
  0xce   :  { %1760 = vmatpush.bf16.msra.mxu3 %v3094_v54 }
  0xcf   :  { %1750 = vmatpush.bf16.msra.mxu2 %v2918_v1  ;;  %v2715_v1 = vld [vmem:[#allocation9 + $0xb8] sm:$0xf0] }
  0xd1   :  { %1772 = vmatpush.bf16.msrb.mxu0 %v2730_v35  ;;  %v2650_v35 = vor.u32 %v3366_v21, %v2649_v17  ;;  %v2778_v21 = vor.u32 %v3398_v61, %v2777_v15  ;;  %v2937_v61 = vld [vmem:[#allocation9 + $0x268] sm:$0xf] }
  0xd2   :  { %1761 = vmatpush.bf16.msra.mxu3 %v3078_v3  ;;  %v3406_v3 = vld [vmem:[#allocation9 + $0x174] sm:$0xf0] }
  0xd3   :  { %1751 = vmatpush.bf16.msra.mxu2 %v2902_v12  ;;  %v2794_v12 = vor.u32 %v3402_v10, %v2793_v9  ;;  %v3113_v9 = vld [vmem:[#allocation9 + $0x3c8] sm:$0xf]  ;;  %v3482_v10 = vld [vmem:[#allocation9 + $0x3d4] sm:$0xf0] }
  0xd4   :  { %v3114_v15 = vor.u32 %v3482_v10, %v3113_v9 }
  0xd5   :  { %1773 = vmatpush.bf16.msrb.mxu0 %v2714_v46  ;;  %v3030_v46 = vor.u32 %v3459_v37, %v3027_v38  ;;  %v2985_v38 = vld [vmem:[#allocation9 + $0x2c8] sm:$0xf] }
  0xd6   :  { %1762 = vmatpush.bf16.msra.mxu3 %v3062_v16  ;;  %v2986_v49 = vor.u32 %v3450_v39, %v2985_v38  ;;  %v3470_v38 = vld [vmem:[#allocation9 + $0x374] sm:$0xf0]  ;;  %v3396_v39 = vld [vmem:[#allocation9 + $0x12c] sm:$0xf] }
  0xd7   :  { %1752 = vmatpush.bf16.msra.mxu2 %v2886_v23  ;;  %v3001_v23 = vld [vmem:[#allocation9 + $0x2e8] sm:$0xf] }
  0xd9   :  { %1774 = vmatpush.bf16.msrb.mxu0 %v2698_v56  ;;  %v2825_v56 = vld [vmem:[#allocation9 + $0x188] sm:$0xf] }
  0xda   :  { %1763 = vmatpush.bf16.msra.mxu3 %v3046_v31  ;;  %v3420_v31 = vld [vmem:[#allocation9 + $0x1ec] sm:$0xf] }
  0xdb   :  { %v786_v4 = vpop.f32.mrf.mxu0 }
  0xdc   :  { %v787_v5 = vadd.f32 %v786_v4, %v774_v57  ;;  %v799_v7 = vpop.f32.mrf.mxu1  ;;  %1727 = vmatmul.bf16.vlgmr.msra.gmra.mxu0 %v3809_v27  ;;  %v3410_v57 = vld [vmem:[#allocation9 + $0x194] sm:$0xf0]  ;;  %v228_v4 = vperm.slane %v3804_v34, 2 }
  0xdd   :  { %1775 = vmatpush.bf16.msrb.mxu0 %v2682_v6  ;;  %v2826_v63 = vor.u32 %v3410_v57, %v2825_v56  ;;  %v2810_v6 = vor.u32 %v3406_v3, %v2809_v2  ;;  %v2635_v57 = vld [vmem:[#allocation9 + $0x18] sm:$0xf0] }
  0xde   :  { %v800_v55 = vadd.f32 %v799_v7, %v787_v5  ;;  %1764 = vmatpush.bf16.msra.mxu3 %v3030_v46  ;;  %v2718_v5 = vor.u32 %v3380_v0, %v2715_v1  ;;  %v3376_v7 = vld [vmem:[#allocation9 + $0x8c] sm:$0xf]  ;;  %v2843_v0 = vld [vmem:[#allocation9 + $0x1b8] sm:$0xf0]  ;;  %v2638_v3 = vor.u32 %v3360_v52, %v2635_v57  ;;  %v3033_v57 = vld [vmem:[#allocation9 + $0x328] sm:$0xf] }
  0xdf   :  { %v2702_v11 = vor.u32 %v3376_v7, %v2699_v8 }
  0xe0   :  { %v882_v13 = vmax.f32 %v800_v55, 0.0  ;;  %v2683_v55 = vld [vmem:[#allocation9 + $0x78] sm:$0xf0] }
  0xe1   :  { %1776 = vmatpush.bf16.msrb.mxu0 %v2666_v18  ;;  %v2686_v20 = vor.u32 %v3372_v14, %v2683_v55 }
  0xe2   :  { %v3815_v26 = vpack.c.bf16 %v882_v13, %v882_v13  ;;  %1765 = vmatpush.bf16.msra.mxu3 %v3014_v58  ;;  %v229_v13 = vperm.slane %v3804_v34, 3  ;;  %v2862_v58 = vor.u32 %v3416_v44, %v2859_v45  ;;  %v3426_v44 = vld [vmem:[#allocation9 + $0x214] sm:$0xf0]  ;;  %v3049_v45 = vld [vmem:[#allocation9 + $0x348] sm:$0xf] }
  0xe3   :  { %v812_v28 = vpop.f32.mrf.mxu2  ;;  %v788_v33 = vpop.f32.mrf.mxu0 }
  0xe4   :  { %1688 = vmatmul.bf16.vlgmr.msrb.gmra.mxu1 %v3815_v26  ;;  %v801_v36 = vpop.f32.mrf.mxu1  ;;  %v813_v62 = vadd.f32 %v812_v28, %v228_v4  ;;  %v2761_v28 = vld [vmem:[#allocation9 + $0x108] sm:$0xf]  ;;  %v2875_v33 = vld [vmem:[#allocation9 + $0x1f8] sm:$0xf0] }
  0xe5   :  { %v3817_v32 = vpop.f32.mrf.mxu3  ;;  %1784 = vmatpush.bf16.msrb.mxu1 %v2874_v22  ;;  %1777 = vmatpush.bf16.msrb.mxu0 %v2650_v35  ;;  %v3368_v22 = vld [vmem:[#allocation9 + $0x4c] sm:$0xf]  ;;  %v2762_v37 = vor.u32 %v3394_v29, %v2761_v28  ;;  %v2878_v42 = vor.u32 %v3420_v31, %v2875_v33  ;;  %v3081_v28 = vld [vmem:[#allocation9 + $0x388] sm:$0xf]  ;;  %v3474_v29 = vld [vmem:[#allocation9 + $0x394] sm:$0xf0] }
  0xe6   :  { %v826_v16 = vadd.f32 %v3817_v32, %v813_v62  ;;  %v3002_v32 = vor.u32 %v3454_v24, %v3001_v23  ;;  %v2670_v34 = vor.u32 %v3368_v22, %v2667_v25  ;;  %v2921_v23 = vld [vmem:[#allocation9 + $0x248] sm:$0xf]  ;;  %v3434_v24 = vld [vmem:[#allocation9 + $0x254] sm:$0xf0]  ;;  %v2795_v31 = vld [vmem:[#allocation9 + $0x158] sm:$0xf0] }
  0xe7   :  { %v2922_v33 = vor.u32 %v3434_v24, %v2921_v23 }
  0xe9   :  { %1785 = vmatpush.bf16.msrb.mxu1 %v2858_v41  ;;  %1778 = vmatpush.bf16.msrb.mxu0 %v2634_v47  ;;  %v2651_v41 = vld [vmem:[#allocation9 + $0x38] sm:$0xf0] }
  0xeb   :  { %v814_v54 = vpop.f32.mrf.mxu2 }
  0xec   :  { %1779 = vmatmul.bf16.vlgmr.msrb.gmra.mxu0 %v3809_v27  ;;  %v3446_v54 = vld [vmem:[#allocation9 + $0x2b4] sm:$0xf0] }
  0xed   :  { %v827_v59 = vpop.f32.mrf.mxu3  ;;  %1823 = vmatpush.bf16.msra.mxu0 %v2750_v50  ;;  %1786 = vmatpush.bf16.msrb.mxu1 %v2842_v51  ;;  %v2654_v51 = vor.u32 %v3364_v40, %v2651_v41  ;;  %v2970_v2 = vor.u32 %v3446_v54, %v2969_v53  ;;  %v2779_v40 = vld [vmem:[#allocation9 + $0x138] sm:$0xf0] }
  0xee   :  { %v3129_v59 = vld [vmem:[#allocation9 + $0x3e8] sm:$0xf] }
  0xf1   :  { %1824 = vmatpush.bf16.msra.mxu0 %v2734_v60  ;;  %1787 = vmatpush.bf16.msrb.mxu1 %v2826_v63  ;;  %v3486_v60 = vld [vmem:[#allocation9 + $0x3f4] sm:$0xf0]  ;;  %v3412_v63 = vld [vmem:[#allocation9 + $0x1ac] sm:$0xf] }
  0xf2   :  { %v3130_v4 = vor.u32 %v3486_v60, %v3129_v59  ;;  %v2846_v8 = vor.u32 %v3412_v63, %v2843_v0  ;;  %v3448_v59 = vld [vmem:[#allocation9 + $0x2cc] sm:$0xf]  ;;  %v2987_v60 = vld [vmem:[#allocation9 + $0x2d8] sm:$0xf0] }
  0xf3   :  { %v2990_v0 = vor.u32 %v3448_v59, %v2987_v60  ;;  %v3488_v59 = vld [vmem:[#allocation12 + $0x8] sm:$0xff] }
  0xf4   :  { %1740 = vmatmul.bf16.vlgmr.msra.gmra.mxu1 %v3815_v26  ;;  %v3500_v60 = vld [vmem:[#allocation12 + $0x68] sm:$0xff] }
  0xf5   :  { %1825 = vmatpush.bf16.msra.mxu0 %v2718_v5  ;;  %1788 = vmatpush.bf16.msrb.mxu1 %v2810_v6  ;;  %v2953_v5 = vld [vmem:[#allocation9 + $0x288] sm:$0xf]  ;;  %v3442_v6 = vld [vmem:[#allocation9 + $0x294] sm:$0xf0] }
  0xf6   :  { %v2954_v55 = vor.u32 %v3442_v6, %v2953_v5  ;;  %v3484_v5 = vld [vmem:[#allocation9 + $0x3ec] sm:$0xf]  ;;  %v3131_v6 = vld [vmem:[#allocation9 + $0x3f8] sm:$0xf0] }
  0xf7   :  { %v3134_v10 = vor.u32 %v3484_v5, %v3131_v6  ;;  %v3509_v5 = vld [vmem:[#allocation12 + $0xb0] sm:$0xff] }
  0xf8   :  { %v3497_v6 = vld [vmem:[#allocation12 + $0x50] sm:$0xff] }
  0xf9   :  { %1826 = vmatpush.bf16.msra.mxu0 %v2702_v11  ;;  %1789 = vmatpush.bf16.msrb.mxu1 %v2794_v12  ;;  %v3408_v11 = vld [vmem:[#allocation9 + $0x18c] sm:$0xf]  ;;  %v2827_v12 = vld [vmem:[#allocation9 + $0x198] sm:$0xf0] }
  0xfb   :  { %v838_v17 = vpop.f32.mrf.mxu0 }
  0xfc   :  { %v839_v18 = vadd.f32 %v838_v17, %v826_v16  ;;  %v851_v19 = vpop.f32.mrf.mxu1  ;;  %v3438_v16 = vld [vmem:[#allocation9 + $0x274] sm:$0xf0]  ;;  %v2830_v17 = vor.u32 %v3408_v11, %v2827_v12  ;;  %v2955_v11 = vld [vmem:[#allocation9 + $0x298] sm:$0xf0]  ;;  %v3480_v12 = vld [vmem:[#allocation9 + $0x3cc] sm:$0xf] }
  0xfd   :  { %v852_v35 = vadd.f32 %v851_v19, %v229_v13  ;;  %1827 = vmatpush.bf16.msra.mxu0 %v2686_v20  ;;  %1790 = vmatpush.bf16.msrb.mxu1 %v2778_v21  ;;  %v3097_v13 = vld [vmem:[#allocation9 + $0x3a8] sm:$0xf]  ;;  %v3404_v19 = vld [vmem:[#allocation9 + $0x16c] sm:$0xf]  ;;  %v2811_v20 = vld [vmem:[#allocation9 + $0x178] sm:$0xf0]  ;;  %v2938_v21 = vor.u32 %v3438_v16, %v2937_v61 }
  0xfe   :  { %v883_v30 = vmax.f32 %v839_v18, 0.0  ;;  %v3478_v18 = vld [vmem:[#allocation9 + $0x3b4] sm:$0xf0]  ;;  %v2814_v25 = vor.u32 %v3404_v19, %v2811_v20  ;;  %v3436_v61 = vld [vmem:[#allocation9 + $0x26c] sm:$0xf] }
  0xff   :  { %v3098_v22 = vor.u32 %v3478_v18, %v3097_v13  ;;  %v2939_v16 = vld [vmem:[#allocation9 + $0x278] sm:$0xf0]  ;;  %v3432_v19 = vld [vmem:[#allocation9 + $0x24c] sm:$0xf] }
 0x100   :  { %v3825_v36 = vpack.c.bf16 %v883_v30, %v883_v30  ;;  %v3400_v30 = vld [vmem:[#allocation9 + $0x14c] sm:$0xf]  ;;  %v3099_v13 = vld [vmem:[#allocation9 + $0x3b8] sm:$0xf0] }
 0x101   :  { %1828 = vmatpush.bf16.msra.mxu0 %v2670_v34  ;;  %1791 = vmatpush.bf16.msrb.mxu1 %v2762_v37  ;;  %v2798_v34 = vor.u32 %v3400_v30, %v2795_v31  ;;  %v3065_v37 = vld [vmem:[#allocation9 + $0x368] sm:$0xf]  ;;  %v2923_v20 = vld [vmem:[#allocation9 + $0x258] sm:$0xf0] }
 0x102   :  { %1701 = vmatmul.bf16.vlgmr.msrb.gmra.mxu2 %v3825_v36  ;;  %v2926_v23 = vor.u32 %v3432_v19, %v2923_v20  ;;  %v3067_v30 = vld [vmem:[#allocation9 + $0x378] sm:$0xf0] }
 0x103   :  { %v864_v43 = vpop.f32.mrf.mxu2  ;;  %1797 = vmatpush.bf16.msrb.mxu2 %v3002_v32  ;;  %v840_v48 = vpop.f32.mrf.mxu0  ;;  %v2905_v32 = vld [vmem:[#allocation9 + $0x228] sm:$0xf] }
 0x104   :  { %v865_v46 = vadd.f32 %v864_v43, %v852_v35  ;;  %v877_v47 = vpop.f32.mrf.mxu3  ;;  %v853_v50 = vpop.f32.mrf.mxu1  ;;  %1792 = vmatmul.bf16.vlgmr.msrb.gmra.mxu1 %v3815_v26  ;;  %v3082_v35 = vor.u32 %v3474_v29, %v3081_v28  ;;  %v2889_v43 = vld [vmem:[#allocation9 + $0x208] sm:$0xf]  ;;  %v3452_v48 = vld [vmem:[#allocation9 + $0x2ec] sm:$0xf]  ;;  %v2907_v28 = vld [vmem:[#allocation9 + $0x238] sm:$0xf0] }
 0x105   :  { %1836 = vmatpush.bf16.msra.mxu1 %v2878_v42  ;;  %1829 = vmatpush.bf16.msra.mxu0 %v2654_v51  ;;  %v3066_v42 = vor.u32 %v3470_v38, %v3065_v37  ;;  %v3392_v50 = vld [vmem:[#allocation9 + $0x10c] sm:$0xf]  ;;  %v2763_v51 = vld [vmem:[#allocation9 + $0x118] sm:$0xf0]  ;;  %v2890_v52 = vor.u32 %v3426_v44, %v2889_v43 }
 0x106   :  { %v878_v56 = vadd.f32 %v877_v47, %v865_v46  ;;  %v2782_v46 = vor.u32 %v3396_v39, %v2779_v40  ;;  %v3466_v47 = vld [vmem:[#allocation9 + $0x354] sm:$0xf0]  ;;  %v3468_v29 = vld [vmem:[#allocation9 + $0x36c] sm:$0xf]  ;;  %v3035_v40 = vld [vmem:[#allocation9 + $0x338] sm:$0xf0] }
 0x107   :  { %1798 = vmatpush.bf16.msrb.mxu2 %v2986_v49  ;;  %v3003_v49 = vld [vmem:[#allocation9 + $0x2f8] sm:$0xf0]  ;;  %v3050_v53 = vor.u32 %v3466_v47, %v3049_v45  ;;  %v3460_v39 = vld [vmem:[#allocation9 + $0x32c] sm:$0xf] }
 0x108   :  { %v884_v1 = vmax.f32 %v878_v56, 0.0  ;;  %v3006_v54 = vor.u32 %v3452_v48, %v3003_v49  ;;  %v2766_v56 = vor.u32 %v3392_v50, %v2763_v51  ;;  %v3019_v43 = vld [vmem:[#allocation9 + $0x318] sm:$0xf0]  ;;  %v3493_v48 = vld [vmem:[#allocation12 + $0x30] sm:$0xff]  ;;  %v3492_v49 = vld [vmem:[#allocation12 + $0x28] sm:$0xff] }
 0x109   :  { %1837 = vmatpush.bf16.msra.mxu1 %v2862_v58  ;;  %1830 = vmatpush.bf16.msra.mxu0 %v2638_v3  ;;  %v3462_v58 = vld [vmem:[#allocation9 + $0x334] sm:$0xf0]  ;;  %v3444_v3 = vld [vmem:[#allocation9 + $0x2ac] sm:$0xf]  ;;  %v3494_v47 = vld [vmem:[#allocation12 + $0x38] sm:$0xff] }
 0x10a   :  { %v3829_v7 = vpack.c.bf16 %v884_v1, %v884_v1  ;;  %v3034_v63 = vor.u32 %v3462_v58, %v3033_v57  ;;  %v3017_v1 = vld [vmem:[#allocation9 + $0x308] sm:$0xf]  ;;  %v3501_v57 = vld [vmem:[#allocation12 + $0x70] sm:$0xff] }
 0x10b   :  { %v866_v62 = vpop.f32.mrf.mxu2  ;;  %1799 = vmatpush.bf16.msrb.mxu2 %v2970_v2  ;;  %v3458_v2 = vld [vmem:[#allocation9 + $0x314] sm:$0xf0]  ;;  %v3491_v51 = vld [vmem:[#allocation12 + $0x20] sm:$0xff] }
 0x10c   :  { %v879_v14 = vpop.f32.mrf.mxu3  ;;  %1714 = vmatmul.bf16.vlgmr.msrb.gmra.mxu3 %v3829_v7  ;;  %1831 = vmatmul.bf16.vlgmr.msra.gmra.mxu0 %v3809_v27  ;;  %v3430_v27 = vld [vmem:[#allocation9 + $0x234] sm:$0xf0]  ;;  %v3440_v62 = vld [vmem:[#allocation9 + $0x28c] sm:$0xf] }
 0x10d   :  { %1810 = vmatpush.bf16.msrb.mxu3 %v3130_v4  ;;  %1838 = vmatpush.bf16.msra.mxu1 %v2846_v8  ;;  %v2906_v41 = vor.u32 %v3430_v27, %v2905_v32  ;;  %v2971_v4 = vld [vmem:[#allocation9 + $0x2b8] sm:$0xf0]  ;;  %v3018_v8 = vor.u32 %v3458_v2, %v3017_v1  ;;  %v3464_v27 = vld [vmem:[#allocation9 + $0x34c] sm:$0xf]  ;;  %v3499_v1 = vld [vmem:[#allocation12 + $0x60] sm:$0xff] }
 0x10e   :  { %v2974_v9 = vor.u32 %v3444_v3, %v2971_v4  ;;  %v3115_v14 = vld [vmem:[#allocation9 + $0x3d8] sm:$0xf0]  ;;  %2143 = vmatpush.bf16.msrb.mxu0 %v3494_v47 }
 0x10f   :  { %1800 = vmatpush.bf16.msrb.mxu2 %v2954_v55  ;;  %v2958_v55 = vor.u32 %v3440_v62, %v2955_v11  ;;  %v2891_v32 = vld [vmem:[#allocation9 + $0x218] sm:$0xf0]  ;;  %v3508_v62 = vld [vmem:[#allocation12 + $0xa8] sm:$0xff] }
 0x110   :  { %v3498_v2 = vld [vmem:[#allocation12 + $0x58] sm:$0xff] }
 0x111   :  { %1811 = vmatpush.bf16.msrb.mxu3 %v3114_v15  ;;  %1839 = vmatpush.bf16.msra.mxu1 %v2830_v17  ;;  %v3118_v15 = vor.u32 %v3480_v12, %v3115_v14  ;;  %v3476_v17 = vld [vmem:[#allocation9 + $0x3ac] sm:$0xf]  ;;  %v3510_v3 = vld [vmem:[#allocation12 + $0xb8] sm:$0xff]  ;;  %v3495_v12 = vld [vmem:[#allocation12 + $0x40] sm:$0xff] }
 0x112   :  { %1753 = vmatmul.bf16.vlgmr.msra.gmra.mxu2 %v3825_v36  ;;  %v3102_v18 = vor.u32 %v3476_v17, %v3099_v13  ;;  %2144 = vmatpush.bf16.msrb.mxu0 %v3493_v48  ;;  %v3507_v14 = vld [vmem:[#allocation12 + $0xa0] sm:$0xff]  ;;  %v3505_v17 = vld [vmem:[#allocation12 + $0x90] sm:$0xff] }
 0x113   :  { %1801 = vmatpush.bf16.msrb.mxu2 %v2938_v21  ;;  %v3472_v21 = vld [vmem:[#allocation9 + $0x38c] sm:$0xf] }
 0x115   :  { %1812 = vmatpush.bf16.msrb.mxu3 %v3098_v22  ;;  %1840 = vmatpush.bf16.msra.mxu1 %v2814_v25  ;;  %v3083_v22 = vld [vmem:[#allocation9 + $0x398] sm:$0xf0]  ;;  %v3428_v25 = vld [vmem:[#allocation9 + $0x22c] sm:$0xf] }
 0x116   :  { %v3086_v24 = vor.u32 %v3472_v21, %v3083_v22  ;;  %v2910_v31 = vor.u32 %v3428_v25, %v2907_v28  ;;  %2145 = vmatpush.bf16.msrb.mxu0 %v3492_v49  ;;  %v3503_v28 = vld [vmem:[#allocation12 + $0x80] sm:$0xff] }
 0x117   :  { %1802 = vmatpush.bf16.msrb.mxu2 %v2922_v33  ;;  %v3070_v33 = vor.u32 %v3468_v29, %v3067_v30  ;;  %v3518_v29 = vld [vmem:[#allocation12 + $0xf8] sm:$0xff] }
 0x119   :  { %1813 = vmatpush.bf16.msrb.mxu3 %v3082_v35  ;;  %1841 = vmatpush.bf16.msra.mxu1 %v2798_v34  ;;  %v3424_v35 = vld [vmem:[#allocation9 + $0x20c] sm:$0xf]  ;;  %v3051_v34 = vld [vmem:[#allocation9 + $0x358] sm:$0xf0] }
 0x11a   :  { %v2894_v37 = vor.u32 %v3424_v35, %v2891_v32  ;;  %v3054_v38 = vor.u32 %v3464_v27, %v3051_v34  ;;  %2146 = vmatpush.bf16.msrb.mxu0 %v3491_v51  ;;  %v3517_v32 = vld [vmem:[#allocation12 + $0xf0] sm:$0xff]  ;;  %v3516_v34 = vld [vmem:[#allocation12 + $0xe8] sm:$0xff] }
 0x11b   :  { %1803 = vmatpush.bf16.msrb.mxu2 %v2906_v41  ;;  %v3038_v41 = vor.u32 %v3460_v39, %v3035_v40  ;;  %v3515_v40 = vld [vmem:[#allocation12 + $0xe0] sm:$0xff] }
 0x11c   :  { %1766 = vmatmul.bf16.vlgmr.msra.gmra.mxu3 %v3829_v7 }
 0x11d   :  { %1814 = vmatpush.bf16.msrb.mxu3 %v3066_v42  ;;  %1842 = vmatpush.bf16.msra.mxu1 %v2782_v46  ;;  %v3456_v42 = vld [vmem:[#allocation9 + $0x30c] sm:$0xf] }
 0x11e   :  { %v3022_v44 = vor.u32 %v3456_v42, %v3019_v43 }
 0x11f   :  { %1804 = vmatpush.bf16.msrb.mxu2 %v2890_v52 }
 0x121   :  { %1815 = vmatpush.bf16.msrb.mxu3 %v3050_v53  ;;  %1843 = vmatpush.bf16.msra.mxu1 %v2766_v56  ;;  %v3490_v53 = vld [vmem:[#allocation12 + $0x18] sm:$0xff] }
 0x122   :  { %1805 = vmatmul.bf16.vlgmr.msrb.gmra.mxu2 %v3825_v36  ;;  %2147 = vmatpush.bf16.msrb.mxu0 %v3490_v53 }
 0x123   :  { %1849 = vmatpush.bf16.msra.mxu2 %v3006_v54 }
 0x124   :  { %1844 = vmatmul.bf16.vlgmr.msra.gmra.mxu1 %v3815_v26  ;;  %v2942_v26 = vor.u32 %v3436_v61, %v2939_v16  ;;  %v3506_v61 = vld [vmem:[#allocation12 + $0x98] sm:$0xff] }
 0x125   :  { %1816 = vmatpush.bf16.msrb.mxu3 %v3034_v63 }
 0x127   :  { %1850 = vmatpush.bf16.msra.mxu2 %v2990_v0  ;;  %v3487_v0 = vld [vmem:[#allocation12] sm:$0xff] }
 0x129   :  { %1817 = vmatpush.bf16.msrb.mxu3 %v3018_v8 }
 0x12b   :  { %1851 = vmatpush.bf16.msra.mxu2 %v2974_v9  ;;  %v3844_v9 = vld [vmem:[#allocation11] sm:$0xf] }
 0x12c   :  { %1818 = vmatmul.bf16.vlgmr.msrb.gmra.mxu3 %v3829_v7  ;;  %v1019_v11 = vperm.slane %v3844_v9, 0  ;;  %v1021_v47 = vperm.slane %v3844_v9, 2 }
 0x12d   :  { %1862 = vmatpush.bf16.msra.mxu3 %v3134_v10  ;;  %v3496_v10 = vld [vmem:[#allocation12 + $0x48] sm:$0xff] }
 0x12f   :  { %1852 = vmatpush.bf16.msra.mxu2 %v2958_v55 }
 0x131   :  { %1863 = vmatpush.bf16.msra.mxu3 %v3118_v15 }
 0x133   :  { %1853 = vmatpush.bf16.msra.mxu2 %v2942_v26 }
 0x135   :  { %1864 = vmatpush.bf16.msra.mxu3 %v3102_v18 }
 0x137   :  { %1854 = vmatpush.bf16.msra.mxu2 %v2926_v23  ;;  %v3504_v23 = vld [vmem:[#allocation12 + $0x88] sm:$0xff] }
 0x139   :  { %1865 = vmatpush.bf16.msra.mxu3 %v3086_v24 }
 0x13b   :  { %1855 = vmatpush.bf16.msra.mxu2 %v2910_v31  ;;  %v1020_v31 = vperm.slane %v3844_v9, 1 }
 0x13d   :  { %1866 = vmatpush.bf16.msra.mxu3 %v3070_v33 }
 0x13f   :  { %1856 = vmatpush.bf16.msra.mxu2 %v2894_v37 }
 0x141   :  { %1867 = vmatpush.bf16.msra.mxu3 %v3054_v38 }
 0x142   :  { %1857 = vmatmul.bf16.vlgmr.msra.gmra.mxu2 %v3825_v36  ;;  %v3502_v36 = vld [vmem:[#allocation12 + $0x78] sm:$0xff] }
 0x143   :  { %2156 = vmatpush.bf16.msrb.mxu1 %v3502_v36  ;;  %2169 = vmatpush.bf16.msrb.mxu2 %v3510_v3  ;;  %v3512_v36 = vld [vmem:[#allocation12 + $0xc8] sm:$0xff] }
 0x145   :  { %1868 = vmatpush.bf16.msra.mxu3 %v3038_v41 }
 0x147   :  { %2157 = vmatpush.bf16.msrb.mxu1 %v3501_v57  ;;  %2170 = vmatpush.bf16.msrb.mxu2 %v3509_v5 }
 0x149   :  { %1869 = vmatpush.bf16.msra.mxu3 %v3022_v44  ;;  %v1676_v45 = vpop.f32.mrf.mxu0 }
 0x14a   :  { %v1677_v16 = vadd.f32 %v1676_v45, %v1019_v11 }
 0x14b   :  { %2158 = vmatpush.bf16.msrb.mxu1 %v3500_v60  ;;  %2171 = vmatpush.bf16.msrb.mxu2 %v3508_v62 }
 0x14c   :  { %1870 = vmatmul.bf16.vlgmr.msra.gmra.mxu3 %v3829_v7  ;;  %v3489_v7 = vld [vmem:[#allocation12 + $0x10] sm:$0xff] }
 0x14d   :  { %2148 = vmatpush.bf16.msrb.mxu0 %v3489_v7  ;;  %2182 = vmatpush.bf16.msrb.mxu3 %v3518_v29 }
 0x14f   :  { %2159 = vmatpush.bf16.msrb.mxu1 %v3499_v1  ;;  %2172 = vmatpush.bf16.msrb.mxu2 %v3507_v14  ;;  %v1022_v1 = vperm.slane %v3844_v9, 3  ;;  %v3531_v9 = vld [vmem:[%s3864_s6] ss:$0 sm:$0xff]  ;;  %s3725_s6 = smov [#allocation14]  }
 0x150   :  { %s2224_s8 = sshll.u32 %s3725_s6, 4  ;;  %s2225_s8 = int_to_ptr.vmem [resolvable:$true] %s2224_s8 }
 0x151   :  { %v1678_v46 = vpop.f32.mrf.mxu0  ;;  %2149 = vmatpush.bf16.msrb.mxu0 %v3488_v59  ;;  %2183 = vmatpush.bf16.msrb.mxu3 %v3517_v32  ;;  %v3511_v59 = vld [vmem:[#allocation12 + $0xc0] sm:$0xff] }
 0x152   :  { %v3514_v46 = vld [vmem:[#allocation12 + $0xd8] sm:$0xff] }
 0x153   :  { %2160 = vmatpush.bf16.msrb.mxu1 %v3498_v2  ;;  %2173 = vmatpush.bf16.msrb.mxu2 %v3506_v61 }
 0x155   :  { %2150 = vmatpush.bf16.msrb.mxu0 %v3487_v0  ;;  %2184 = vmatpush.bf16.msrb.mxu3 %v3516_v34 }
 0x157   :  { %2161 = vmatpush.bf16.msrb.mxu1 %v3497_v6  ;;  %2174 = vmatpush.bf16.msrb.mxu2 %v3505_v17 }
 0x159   :  { %v3840_v50 = vpop.f32.mrf.mxu0  ;;  %2185 = vmatpush.bf16.msrb.mxu3 %v3515_v40 }
 0x15a   :  { %v1729_v27 = vadd.f32 %v3840_v50, %v1020_v31  ;;  %v3513_v50 = vld [vmem:[#allocation12 + $0xd0] sm:$0xff] }
 0x15b   :  { %2162 = vmatpush.bf16.msrb.mxu1 %v3496_v10  ;;  %2175 = vmatpush.bf16.msrb.mxu2 %v3504_v23 }
 0x15d   :  { %2186 = vmatpush.bf16.msrb.mxu3 %v3514_v46 }
 0x15f   :  { %2163 = vmatpush.bf16.msrb.mxu1 %v3495_v12  ;;  %2176 = vmatpush.bf16.msrb.mxu2 %v3503_v28 }
 0x161   :  { %v1689_v52 = vpop.f32.mrf.mxu1  ;;  %v1730_v54 = vpop.f32.mrf.mxu0  ;;  %2187 = vmatpush.bf16.msrb.mxu3 %v3513_v50 }
 0x162   :  { %v1690_v13 = vadd.f32 %v1689_v52, %v1677_v16 }
 0x165   :  { %2188 = vmatpush.bf16.msrb.mxu3 %v3512_v36 }
 0x169   :  { %v1691_v56 = vpop.f32.mrf.mxu1  ;;  %v3842_v58 = vpop.f32.mrf.mxu0  ;;  %2189 = vmatpush.bf16.msrb.mxu3 %v3511_v59 }
 0x16a   :  { %v1781_v51 = vadd.f32 %v3842_v58, %v1021_v47 }
 0x171   :  { %v1741_v63 = vpop.f32.mrf.mxu1  ;;  %v1782_v4 = vpop.f32.mrf.mxu0 }
 0x172   :  { %v1742_v37 = vadd.f32 %v1741_v63, %v1729_v27 }
 0x179   :  { %v1743_v8 = vpop.f32.mrf.mxu1 }
 0x181   :  { %v1793_v55 = vpop.f32.mrf.mxu1 }
 0x182   :  { %v1794_v53 = vadd.f32 %v1793_v55, %v1781_v51 }
 0x185   :  { %v1702_v15 = vpop.f32.mrf.mxu2 }
 0x186   :  { %v1703_v19 = vadd.f32 %v1702_v15, %v1690_v13 }
 0x189   :  { %v1832_v26 = vpop.f32.mrf.mxu0  ;;  %v1795_v18 = vpop.f32.mrf.mxu1 }
 0x18a   :  { %v1833_v3 = vadd.f32 %v1832_v26, %v1022_v1 }
 0x18d   :  { %v1704_v20 = vpop.f32.mrf.mxu2 }
 0x18f   :  { %v1715_v21 = vpop.f32.mrf.mxu3 }
 0x190   :  { %v1716_v22 = vadd.f32 %v1715_v21, %v1703_v19 }
 0x191   :  { %v1834_v30 = vpop.f32.mrf.mxu0 }
 0x192   :  { %v1875_v24 = vmax.f32 %v1716_v22, 0.0 }
 0x194   :  { %v1879_v25 = vpack.c.bf16 %v1875_v24, %v1875_v24 }
 0x195   :  { %v1754_v33 = vpop.f32.mrf.mxu2 }
 0x196   :  { %2151 = vmatmul.bf16.vlgmr.msrb.gmra.mxu0 %v1879_v25  ;;  %v1755_v38 = vadd.f32 %v1754_v33, %v1742_v37 }
 0x197   :  { %v1717_v35 = vpop.f32.mrf.mxu3 }
 0x19d   :  { %v1756_v39 = vpop.f32.mrf.mxu2 }
 0x19f   :  { %v1767_v41 = vpop.f32.mrf.mxu3 }
 0x1a0   :  { %v1768_v42 = vadd.f32 %v1767_v41, %v1755_v38 }
 0x1a1   :  { %v1845_v44 = vpop.f32.mrf.mxu1 }
 0x1a2   :  { %v1876_v43 = vmax.f32 %v1768_v42, 0.0  ;;  %v1846_v58 = vadd.f32 %v1845_v44, %v1833_v3 }
 0x1a4   :  { %v1880_v45 = vpack.c.bf16 %v1876_v43, %v1876_v43 }
 0x1a5   :  { %v1806_v48 = vpop.f32.mrf.mxu2 }
 0x1a6   :  { %2164 = vmatmul.bf16.vlgmr.msrb.gmra.mxu1 %v1880_v45  ;;  %v1807_v54 = vadd.f32 %v1806_v48, %v1794_v53 }
 0x1a7   :  { %v1769_v49 = vpop.f32.mrf.mxu3 }
 0x1a9   :  { %v1847_v52 = vpop.f32.mrf.mxu1 }
 0x1ad   :  { %v1808_v56 = vpop.f32.mrf.mxu2 }
 0x1af   :  { %v1819_v7 = vpop.f32.mrf.mxu3 }
 0x1b0   :  { %v1820_v57 = vadd.f32 %v1819_v7, %v1807_v54 }
 0x1b2   :  { %v1877_v60 = vmax.f32 %v1820_v57, 0.0 }
 0x1b4   :  { %v1881_v63 = vpack.c.bf16 %v1877_v60, %v1877_v60 }
 0x1b6   :  { %2177 = vmatmul.bf16.vlgmr.msrb.gmra.mxu2 %v1881_v63 }
 0x1b7   :  { %v1821_v0 = vpop.f32.mrf.mxu3 }
 0x1c5   :  { %v1858_v2 = vpop.f32.mrf.mxu2 }
 0x1c6   :  { %v1859_v4 = vadd.f32 %v1858_v2, %v1846_v58 }
 0x1cd   :  { %v1860_v5 = vpop.f32.mrf.mxu2 }
 0x1cf   :  { %v1871_v6 = vpop.f32.mrf.mxu3 }
 0x1d0   :  { %v1872_v8 = vadd.f32 %v1871_v6, %v1859_v4 }
 0x1d2   :  { %v1878_v10 = vmax.f32 %v1872_v8, 0.0 }
 0x1d4   :  { %v1882_v62 = vpack.c.bf16 %v1878_v10, %v1878_v10 }
 0x1d6   :  { %2190 = vmatmul.bf16.vlgmr.msrb.gmra.mxu3 %v1882_v62 }
 0x1d7   :  { %v1873_v11 = vpop.f32.mrf.mxu3 }
 0x213   :  { %v2152_v12 = vpop.f32.mrf.mxu0 }
 0x214   :  { %v2153_v17 = vadd.f32 %v3531_v9, %v2152_v12 }
 0x21b   :  { %v2154_v14 = vpop.f32.mrf.mxu0 }
 0x223   :  { %v2165_v55 = vpop.f32.mrf.mxu1 }
 0x224   :  { %v2166_v13 = vadd.f32 %v2165_v55, %v2153_v17 }
 0x22b   :  { %v2167_v15 = vpop.f32.mrf.mxu1 }
 0x239   :  { %v2178_v61 = vpop.f32.mrf.mxu2 }
 0x23a   :  { %v2179_v26 = vadd.f32 %v2178_v61, %v2166_v13 }
 0x241   :  { %v2180_v16 = vpop.f32.mrf.mxu2 }
 0x259   :  { %v2191_v18 = vpop.f32.mrf.mxu3 }
 0x25a   :  { %v2192_v19 = vadd.f32 %v2191_v18, %v2179_v26 }
 0x25c   :  { %2195 = vmax.xlane.f32.xlu0 %v2192_v19 }
 0x261   :  { %v2193_v20 = vpop.f32.mrf.mxu3 }
 0x2cf   :  { %v2196_v21 = vpop.xlane.xlu0 %2195 }
 0x2d0   :  { %v2197_v22 = vsub.f32 %v2192_v19, %v2196_v21 }
 0x2d2   :  { %v2198_v23 = vmul.f32 1.442695, %v2197_v22 }
 0x2d4   :  { %3532 = vpow2.f32 %v2198_v23 }
 0x2da   :  { %v3533_v24 = vpop.eup %3532 }
 0x2db   :  { %2200 = vadd.xlane.f32.xlu0 %v3533_v24 }
 0x34e   :  { %v2201_v25 = vpop.xlane.xlu0 %2200 }
 0x34f   :  { %3534 = vrcp.f32 %v2201_v25  ;;  %v2213_v31 = vand.u32 2147483648, %v2201_v25  ;;  %v2211_v35 = vand.u32 2147483647, %v2201_v25  ;;  %vm2207_vm3 = vweird.f32 %v2201_v25 }
 0x351   :  { %v2214_v27 = vor.u32 1.1754944e-38, %v2213_v31  ;;  %vm2212_vm5 = vcmp.eq.f32.partialorder %v2211_v35, 8.507059e+37 }
 0x355   :  { %v3535_v28 = vpop.eup %3534 }
 0x356   :  { %v2203_v29 = vmul.f32 %v3535_v28, %v2201_v25  ;;  %vm2208_vm2 = vweird.f32 %v3535_v28 }
 0x357   :  { %vm2209_vm4 = vmor %vm2207_vm3, %vm2208_vm2 }
 0x358   :  { %v2204_v30 = vsub.f32 1.0, %v2203_v29 }
 0x35a   :  { %v2205_v33 = vmul.f32 %v3535_v28, %v2204_v30 }
 0x35c   :  { %v2206_v32 = vadd.f32 %v3535_v28, %v2205_v33 }
 0x35e   :  { %v2210_v34 = vsel %vm2209_vm4, %v3535_v28, %v2206_v32 }
 0x35f   :  { %v2215_v37 = vsel %vm2212_vm5, %v2214_v27, %v2210_v34 }
 0x360   :  { %v2216_v38 = vmul.f32 %v3533_v24, %v2215_v37 }
 0x362   :  { %v2217_v39 = vpack.c.bf16 %v2216_v38, %v2216_v38 }
 0x364   :  { %2218 = vst [vmem:[#allocation14] sm:$0xf] %v2217_v39 }
 0x365   :  { %2229 = dma.vmem_to_hbm [thread:$0]  %s2225_s8, 64, %s2227_s11, [#allocation5]  }
 0x366   :  { %3712 = dma.done.wait [#allocation5], 64  }
 0x367   :  { %3713 = vsyncadd [#allocation5], 4294967232 }
 0x368   :  { %2234 = vsyncpa [#allocation4], 1 }
 0x369   :  { %2235 = vsyncpa [#allocation7], 1 }
 0x36a   :  { %2236 = vsyncpa [#allocation10], 1 }
 0x36b   :  { %2237 = vsyncpa [#allocation13], 1 }
 0x36c   :  { %2238 = vsyncpa [#allocation5], 1 }

</bundles_post_ra>
